<compile_context>
chip_gen: v7x
topology: tpu7x:2x2x1
jax: 0.10.0
libtpu: 0.0.40
codegen_flags: <defaults>
</compile_context>

<pallas_src>
import functools

import jax
import jax.numpy as jnp
import numpy as np
from jax import lax
from jax.experimental import pallas as pl
from jax.experimental.pallas import tpu as pltpu

_VMEM_LIMIT = 32 * 1024 * 1024  # conservative: fits v7x's 64 MiB physical VMEM


def _gelu_tanh(z):
    c = 0.7978845608028654  # sqrt(2/pi)
    return 0.5 * z * (1.0 + jnp.tanh(c * (z + 0.044715 * z * z * z)))


def _round_up(a, m):
    return (a + m - 1) // m * m


# ------------------------------------------------------------------ kernel 1
def _pre_kernel(x_ref, w_ref, b_ref, pre_ref):
    """pre = GELU(x @ Wpre + b) for one node tile (bf16 MXU, f32 elsewhere)."""
    xb = x_ref[...].astype(jnp.bfloat16)
    acc = jnp.dot(xb, w_ref[...], preferred_element_type=jnp.float32)
    pre_ref[...] = _gelu_tanh(acc + b_ref[...])


# ------------------------------------------------------------------ kernel 2
def _edge_msg_kernel(src_ref, bases_ref, pre_ref, wf1_ref, bf1_ref,
                     wf2_ref, bf2_ref, msg_ref, gath_ref):
    """msg[e] = filter_encoder(bases[e]) * pre[src[e]] for one edge tile.

    src indices live in SMEM (scalar prefetch); the gather is index based
    (dynamic row loads from the VMEM-resident pre table), i.e. O(TE*H) work,
    not a dense one-hot matmul.
    """
    te = gath_ref.shape[0]
    k = pl.program_id(0)

    h = _gelu_tanh(
        jnp.dot(bases_ref[...], wf1_ref[...],
                preferred_element_type=jnp.float32) + bf1_ref[...])
    v = _gelu_tanh(
        jnp.dot(h.astype(jnp.bfloat16), wf2_ref[...],
                preferred_element_type=jnp.float32) + bf2_ref[...])

    def gather_row(e, carry):
        s = src_ref[k * te + e]
        gath_ref[pl.ds(e, 1), :] = pre_ref[pl.ds(s, 1), :]
        return carry

    lax.fori_loop(0, te, gather_row, 0)
    # TODO(synk): replace the per-row loop with a vectorized dynamic gather /
    # DMA gather if the gather ever becomes the bottleneck.

    msg_ref[...] = (gath_ref[...] * v).astype(msg_ref.dtype)


# ------------------------------------------------------------------ kernel 3
def _aggr_ffn_kernel(dst_ref, x_ref, msg_ref, wa_ref, ba_ref, wb_ref, bb_ref,
                     out_ref, acc_ref):
    """Accumulate aggr over edge tiles; on the last tile fuse residuals + FFN."""
    k = pl.program_id(1)
    tn = acc_ref.shape[0]
    te = msg_ref.shape[0]

    @pl.when(k == 0)
    def _():
        acc_ref[...] = jnp.zeros_like(acc_ref)

    # 0/1 scatter block built in-registers from the dst index vector: no dense
    # [N, E] incidence matrix in HBM.  Padded edges carry dst == -1 -> zeros.
    row_ids = (pl.program_id(0) * tn
               + lax.broadcasted_iota(jnp.int32, (tn, te), 0))
    m_blk = jnp.where(row_ids == dst_ref[...], 1.0, 0.0).astype(jnp.bfloat16)
    acc_ref[...] += jnp.dot(m_blk, msg_ref[...],
                            preferred_element_type=jnp.float32)

    @pl.when(k == pl.num_programs(1) - 1)
    def _():
        x1 = x_ref[...] + acc_ref[...]                      # residual 1 (f32)
        y = _gelu_tanh(
            jnp.dot(x1.astype(jnp.bfloat16), wa_ref[...],
                    preferred_element_type=jnp.float32) + ba_ref[...])
        y = _gelu_tanh(
            jnp.dot(y.astype(jnp.bfloat16), wb_ref[...],
                    preferred_element_type=jnp.float32) + bb_ref[...])
        out_ref[...] = x1 + y                               # residual 2 (f32)


# ------------------------------------------------------------------ wrapper
@functools.partial(jax.jit, static_argnames=("tn", "te"))
def convl_forward(x, bases, src, dst, params, *, tn=None, te=None):
    N, H = x.shape
    E, B = bases.shape
    f32, bf16 = jnp.float32, jnp.bfloat16

    H_pad = _round_up(H, 128)
    B_pad = _round_up(B, 128)           # pad num_basis contraction (K=8 -> 128)
    if tn is None:
        tn = 256 if N >= 256 else _round_up(N, 8)
    if te is None:
        te = 512 if E >= 512 else _round_up(E, 16)
    assert tn % 8 == 0, "node tile must be a multiple of 8"
    assert te % 16 == 0, "edge tile must be a multiple of 16"
    N_pad = _round_up(N, tn)
    E_pad = _round_up(E, te)
    if E_pad > te:
        assert te % 128 == 0, "tiled edge axis needs a lane-aligned dst block"
    n_tiles = N_pad // tn
    e_tiles = E_pad // te

    # ---- pad inputs / parameters (zero-padded lanes stay exactly zero).
    xp = jnp.zeros((N_pad, H_pad), f32).at[:N, :H].set(x)
    basesp = jnp.zeros((E_pad, B_pad), bf16).at[:E, :B].set(bases.astype(bf16))
    srcp = jnp.zeros((E_pad,), jnp.int32).at[:E].set(src.astype(jnp.int32))
    dstp = jnp.full((1, E_pad), -1, jnp.int32).at[0, :E].set(dst.astype(jnp.int32))

    def pad_w(w, rows, cols):
        return jnp.zeros((rows, cols), bf16).at[:w.shape[0], :w.shape[1]].set(
            w.astype(bf16))

    def pad_b(b, cols):
        b = b.reshape(1, -1)
        return jnp.zeros((1, cols), f32).at[:, :b.shape[1]].set(b)

    w_pre = pad_w(params["w_pre"], H_pad, H_pad)
    b_pre = pad_b(params["b_pre"], H_pad)
    wf1 = pad_w(params["wf1"], B_pad, H_pad)
    bf1 = pad_b(params["bf1"], H_pad)
    wf2 = pad_w(params["wf2"], H_pad, H_pad)
    bf2 = pad_b(params["bf2"], H_pad)
    wa = pad_w(params["wa"], H_pad, H_pad)
    ba = pad_b(params["ba"], H_pad)
    wb = pad_w(params["wb"], H_pad, H_pad)
    bb = pad_b(params["bb"], H_pad)

    # ---- call 1: node-tiled pre_ffn.
    cost1 = pl.CostEstimate(
        flops=2 * N_pad * H_pad * H_pad,
        transcendentals=N_pad * H_pad,
        bytes_accessed=4 * (2 * N_pad * H_pad + H_pad) + 2 * H_pad * H_pad)
    pre = pl.pallas_call(
        _pre_kernel,
        out_shape=jax.ShapeDtypeStruct((N_pad, H_pad), f32),
        grid=(n_tiles,),
        in_specs=[
            pl.BlockSpec((tn, H_pad), lambda i: (i, 0)),
            pl.BlockSpec((H_pad, H_pad), lambda i: (0, 0)),
            pl.BlockSpec((1, H_pad), lambda i: (0, 0)),
        ],
        out_specs=pl.BlockSpec((tn, H_pad), lambda i: (i, 0)),
        scratch_shapes=[],
        compiler_params=pltpu.CompilerParams(
            dimension_semantics=("parallel",),
            vmem_limit_bytes=_VMEM_LIMIT),
        cost_estimate=cost1,
    )(xp, w_pre, b_pre)

    # ---- call 2: edge-tiled filter encoder + index-based gather + u_mul_e.
    cost2 = pl.CostEstimate(
        flops=2 * E_pad * (B_pad + H_pad) * H_pad + 2 * E_pad * H_pad,
        transcendentals=2 * E_pad * H_pad,
        bytes_accessed=(2 * E_pad * B_pad + 4 * N_pad * H_pad
                        + 2 * (B_pad + H_pad) * H_pad + 2 * E_pad * H_pad))
    msg = pl.pallas_call(
        _edge_msg_kernel,
        out_shape=jax.ShapeDtypeStruct((E_pad, H_pad), bf16),
        grid_spec=pltpu.PrefetchScalarGridSpec(
            num_scalar_prefetch=1,
            grid=(e_tiles,),
            in_specs=[
                pl.BlockSpec((te, B_pad), lambda k, src_idx: (k, 0)),
                pl.BlockSpec((N_pad, H_pad), lambda k, src_idx: (0, 0)),
                pl.BlockSpec((B_pad, H_pad), lambda k, src_idx: (0, 0)),
                pl.BlockSpec((1, H_pad), lambda k, src_idx: (0, 0)),
                pl.BlockSpec((H_pad, H_pad), lambda k, src_idx: (0, 0)),
                pl.BlockSpec((1, H_pad), lambda k, src_idx: (0, 0)),
            ],
            out_specs=pl.BlockSpec((te, H_pad), lambda k, src_idx: (k, 0)),
            scratch_shapes=[pltpu.VMEM((te, H_pad), f32)],
        ),
        compiler_params=pltpu.CompilerParams(
            dimension_semantics=("parallel",),
            vmem_limit_bytes=_VMEM_LIMIT),
        cost_estimate=cost2,
    )(srcp, basesp, pre, wf1, bf1, wf2, bf2)

    # ---- call 3: (node-tile, edge-tile) grid: scatter-sum reduction + ffn.
    cost3 = pl.CostEstimate(
        flops=2 * N_pad * E_pad * H_pad + 4 * N_pad * H_pad * H_pad,
        transcendentals=2 * N_pad * H_pad,
        bytes_accessed=(8 * N_pad * H_pad + 4 * H_pad * H_pad
                        + n_tiles * (2 * E_pad * H_pad + 4 * E_pad)))
    out_p = pl.pallas_call(
        _aggr_ffn_kernel,
        out_shape=jax.ShapeDtypeStruct((N_pad, H_pad), f32),
        grid=(n_tiles, e_tiles),
        in_specs=[
            pl.BlockSpec((1, te), lambda i, k: (0, k)),        # dst indices
            pl.BlockSpec((tn, H_pad), lambda i, k: (i, 0)),    # x tile
            pl.BlockSpec((te, H_pad), lambda i, k: (k, 0)),    # msg tile
            pl.BlockSpec((H_pad, H_pad), lambda i, k: (0, 0)),
            pl.BlockSpec((1, H_pad), lambda i, k: (0, 0)),
            pl.BlockSpec((H_pad, H_pad), lambda i, k: (0, 0)),
            pl.BlockSpec((1, H_pad), lambda i, k: (0, 0)),
        ],
        out_specs=pl.BlockSpec((tn, H_pad), lambda i, k: (i, 0)),
        scratch_shapes=[pltpu.VMEM((tn, H_pad), f32)],
        compiler_params=pltpu.CompilerParams(
            dimension_semantics=("parallel", "arbitrary"),
            vmem_limit_bytes=_VMEM_LIMIT),
        cost_estimate=cost3,
    )(dstp, xp, msg, wa, ba, wb, bb)

    return out_p[:N, :H]


# ------------------------------------------------------------------ reference
def _reference(x, bases, src, dst, params, n_nodes):
    """Pure-JAX reference replicating the kernel's bf16-MXU / f32-accum math."""
    f32, bf16 = jnp.float32, jnp.bfloat16

    def mm(a, b):
        return jnp.dot(a.astype(bf16), b.astype(bf16),
                       preferred_element_type=f32)

    pre = _gelu_tanh(mm(x, params["w_pre"]) + params["b_pre"].reshape(1, -1))
    h = _gelu_tanh(mm(bases, params["wf1"]) + params["bf1"].reshape(1, -1))
    v = _gelu_tanh(mm(h, params["wf2"]) + params["bf2"].reshape(1, -1))
    msg = (pre[src] * v).astype(bf16).astype(f32)
    aggr = jax.ops.segment_sum(msg, dst, num_segments=n_nodes)
    x1 = x + aggr
    y = _gelu_tanh(mm(x1, params["wa"]) + params["ba"].reshape(1, -1))
    y = _gelu_tanh(mm(y, params["wb"]) + params["bb"].reshape(1, -1))
    return x1 + y


if __name__ == "__main__":
    # Small graph chosen to exercise every tiling path: node padding
    # (13 -> 16 rows, 2 node tiles of 8), multi-tile edge reduction + edge
    # padding (200 -> 256 edges, 2 edge tiles of 128), H=32 -> 128 lane
    # padding, num_basis=8 -> 128 contraction padding.
    N, E, H, B = 13, 200, 32, 8
    key = jax.random.PRNGKey(0)
    keys = jax.random.split(key, 9)

    x = jax.random.normal(keys[0], (N, H), dtype=jnp.float32)
    bases = jax.random.normal(keys[1], (E, B), dtype=jnp.float32)
    src = jax.random.randint(keys[2], (E,), 0, N, dtype=jnp.int32)
    dst = jax.random.randint(keys[3], (E,), 0, N, dtype=jnp.int32)

    def init_linear(k, fan_in, fan_out):
        kw, kb = jax.random.split(k)
        lim = 1.0 / np.sqrt(fan_in)
        w = jax.random.uniform(kw, (fan_in, fan_out), jnp.float32, -lim, lim)
        b = jax.random.uniform(kb, (1, fan_out), jnp.float32, -lim, lim)
        return w, b

    w_pre, b_pre = init_linear(keys[4], H, H)
    wf1, bf1 = init_linear(keys[5], B, H)
    wf2, bf2 = init_linear(keys[6], H, H)
    wa, ba = init_linear(keys[7], H, H)
    wb, bb = init_linear(keys[8], H, H)
    params = dict(w_pre=w_pre, b_pre=b_pre, wf1=wf1, bf1=bf1, wf2=wf2, bf2=bf2,
                  wa=wa, ba=ba, wb=wb, bb=bb)

    out = convl_forward(x, bases, src, dst, params, tn=8, te=128)
    out = jax.block_until_ready(out)

    ref = jax.block_until_ready(_reference(x, bases, src, dst, params, N))
    assert out.shape == (N, H)
    np.testing.assert_allclose(np.asarray(out), np.asarray(ref),
                               rtol=5e-3, atol=5e-3)
    print("KERNEL_OK")
</pallas_src>

<mosaic_0001>
module attributes {stable_mosaic.version = 11 : i64} {
  func.func @_pre_kernel(%arg0: i32, %arg1: memref<8x128xf32, #tpu.memory_space<vmem>>, %arg2: memref<128x128xbf16, #tpu.memory_space<vmem>>, %arg3: memref<1x128xf32, #tpu.memory_space<vmem>>, %arg4: memref<8x128xf32, #tpu.memory_space<vmem>>) attributes {dimension_semantics = [#tpu.dimension_semantics<parallel>], iteration_bounds = array<i64: 2>, scalar_prefetch = 0 : i64, scratch_operands = 0 : i64, tpu.core_type = #tpu.core_type<tc>, window_params = [{transform_indices = @transform_0, window_bounds = array<i64: 8, 128>}, {pipeline_mode = #tpu.pipeline_mode<synchronous>, transform_indices = @transform_1, window_bounds = array<i64: 128, 128>}, {pipeline_mode = #tpu.pipeline_mode<synchronous>, transform_indices = @transform_2, window_bounds = array<i64: 1, 128>}, {transform_indices = @transform_3, window_bounds = array<i64: 8, 128>}]} {
    %c0 = arith.constant 0 : index
    %c0_0 = arith.constant 0 : index
    %0 = vector.load %arg1[%c0, %c0_0] : memref<8x128xf32, #tpu.memory_space<vmem>>, vector<8x128xf32>
    %1 = arith.truncf %0 : vector<8x128xf32> to vector<8x128xbf16>
    %c0_1 = arith.constant 0 : index
    %c0_2 = arith.constant 0 : index
    %2 = vector.load %arg2[%c0_1, %c0_2] : memref<128x128xbf16, #tpu.memory_space<vmem>>, vector<128x128xbf16>
    %cst = arith.constant dense<0.000000e+00> : vector<8x128xf32>
    %3 = tpu.matmul %1, %2, %cst {dimension_numbers = #tpu.dot_dimension_numbers<[1], [0], [0], [1], [0, 0, 1, 1], [], []>} : vector<8x128xbf16>, vector<128x128xbf16>, vector<8x128xf32> -> vector<8x128xf32>
    %c0_3 = arith.constant 0 : index
    %c0_4 = arith.constant 0 : index
    %4 = vector.load %arg3[%c0_3, %c0_4] : memref<1x128xf32, #tpu.memory_space<vmem>>, vector<1x128xf32>
    %5 = vector.broadcast %4 : vector<1x128xf32> to vector<8x128xf32>
    %6 = arith.addf %3, %5 : vector<8x128xf32>
    %cst_5 = arith.constant 5.000000e-01 : f32
    %7 = vector.broadcast %cst_5 : f32 to vector<8x128xf32>
    %8 = arith.mulf %7, %6 : vector<8x128xf32>
    %cst_6 = arith.constant 4.471500e-02 : f32
    %9 = vector.broadcast %cst_6 : f32 to vector<8x128xf32>
    %10 = arith.mulf %9, %6 : vector<8x128xf32>
    %11 = arith.mulf %10, %6 : vector<8x128xf32>
    %12 = arith.mulf %11, %6 : vector<8x128xf32>
    %13 = arith.addf %6, %12 : vector<8x128xf32>
    %cst_7 = arith.constant 0.797884583 : f32
    %14 = vector.broadcast %cst_7 : f32 to vector<8x128xf32>
    %15 = arith.mulf %14, %13 : vector<8x128xf32>
    %16 = math.tanh %15 : vector<8x128xf32>
    %cst_8 = arith.constant 1.000000e+00 : f32
    %17 = vector.broadcast %cst_8 : f32 to vector<8x128xf32>
    %18 = arith.addf %17, %16 : vector<8x128xf32>
    %19 = arith.mulf %8, %18 : vector<8x128xf32>
    %c0_9 = arith.constant 0 : index
    %c0_10 = arith.constant 0 : index
    %20 = vector.load %arg4[%c0_9, %c0_10] : memref<8x128xf32, #tpu.memory_space<vmem>>, vector<8x128xf32>
    tpu.vector_store %arg4[%c0_9, %c0_10], %19 {strides = array<i32>} : memref<8x128xf32, #tpu.memory_space<vmem>>, vector<8x128xf32>,
    return
  }
  func.func @transform_0(%arg0: i32) -> (i32, i32) {
    %c0_i32 = arith.constant 0 : i32
    %c0_i32_0 = arith.constant 0 : i32
    return %arg0, %c0_i32 : i32, i32
  }
  func.func @transform_1(%arg0: i32) -> (i32, i32) {
    %c0_i32 = arith.constant 0 : i32
    %c0_i32_0 = arith.constant 0 : i32
    %c0_i32_1 = arith.constant 0 : i32
    return %c0_i32, %c0_i32_0 : i32, i32
  }
  func.func @transform_2(%arg0: i32) -> (i32, i32) {
    %c0_i32 = arith.constant 0 : i32
    %c0_i32_0 = arith.constant 0 : i32
    %c0_i32_1 = arith.constant 0 : i32
    return %c0_i32, %c0_i32_0 : i32, i32
  }
  func.func @transform_3(%arg0: i32) -> (i32, i32) {
    %c0_i32 = arith.constant 0 : i32
    %c0_i32_0 = arith.constant 0 : i32
    return %arg0, %c0_i32 : i32, i32
  }
}

module attributes {stable_mosaic.version = 11 : i64} {
  func.func @_edge_msg_kernel(%arg0: i32, %arg1: memref<256xi32, #tpu.memory_space<smem>>, %arg2: memref<128x128xbf16, #tpu.memory_space<vmem>>, %arg3: memref<16x128xf32, #tpu.memory_space<vmem>>, %arg4: memref<128x128xbf16, #tpu.memory_space<vmem>>, %arg5: memref<1x128xf32, #tpu.memory_space<vmem>>, %arg6: memref<128x128xbf16, #tpu.memory_space<vmem>>, %arg7: memref<1x128xf32, #tpu.memory_space<vmem>>, %arg8: memref<128x128xbf16, #tpu.memory_space<vmem>>, %arg9: memref<128x128xf32, #tpu.memory_space<vmem>>) attributes {dimension_semantics = [#tpu.dimension_semantics<parallel>], iteration_bounds = array<i64: 2>, scalar_prefetch = 1 : i64, scratch_operands = 1 : i64, tpu.core_type = #tpu.core_type<tc>, window_params = [{transform_indices = @transform_0, window_bounds = array<i64: 128, 128>}, {pipeline_mode = #tpu.pipeline_mode<synchronous>, transform_indices = @transform_1, window_bounds = array<i64: 16, 128>}, {pipeline_mode = #tpu.pipeline_mode<synchronous>, transform_indices = @transform_2, window_bounds = array<i64: 128, 128>}, {pipeline_mode = #tpu.pipeline_mode<synchronous>, transform_indices = @transform_3, window_bounds = array<i64: 1, 128>}, {pipeline_mode = #tpu.pipeline_mode<synchronous>, transform_indices = @transform_4, window_bounds = array<i64: 128, 128>}, {pipeline_mode = #tpu.pipeline_mode<synchronous>, transform_indices = @transform_5, window_bounds = array<i64: 1, 128>}, {transform_indices = @transform_6, window_bounds = array<i64: 128, 128>}]} {
    %c0 = arith.constant 0 : index
    %c0_0 = arith.constant 0 : index
    %0 = vector.load %arg2[%c0, %c0_0] : memref<128x128xbf16, #tpu.memory_space<vmem>>, vector<128x128xbf16>
    %c0_1 = arith.constant 0 : index
    %c0_2 = arith.constant 0 : index
    %1 = vector.load %arg4[%c0_1, %c0_2] : memref<128x128xbf16, #tpu.memory_space<vmem>>, vector<128x128xbf16>
    %cst = arith.constant dense<0.000000e+00> : vector<128x128xf32>
    %2 = tpu.matmul %0, %1, %cst {dimension_numbers = #tpu.dot_dimension_numbers<[1], [0], [0], [1], [0, 0, 1, 1], [], []>} : vector<128x128xbf16>, vector<128x128xbf16>, vector<128x128xf32> -> vector<128x128xf32>
    %c0_3 = arith.constant 0 : index
    %c0_4 = arith.constant 0 : index
    %3 = vector.load %arg5[%c0_3, %c0_4] : memref<1x128xf32, #tpu.memory_space<vmem>>, vector<1x128xf32>
    %4 = vector.broadcast %3 : vector<1x128xf32> to vector<128x128xf32>
    %5 = arith.addf %2, %4 : vector<128x128xf32>
    %cst_5 = arith.constant 5.000000e-01 : f32
    %6 = vector.broadcast %cst_5 : f32 to vector<128x128xf32>
    %7 = arith.mulf %6, %5 : vector<128x128xf32>
    %cst_6 = arith.constant 4.471500e-02 : f32
    %8 = vector.broadcast %cst_6 : f32 to vector<128x128xf32>
    %9 = arith.mulf %8, %5 : vector<128x128xf32>
    %10 = arith.mulf %9, %5 : vector<128x128xf32>
    %11 = arith.mulf %10, %5 : vector<128x128xf32>
    %12 = arith.addf %5, %11 : vector<128x128xf32>
    %cst_7 = arith.constant 0.797884583 : f32
    %13 = vector.broadcast %cst_7 : f32 to vector<128x128xf32>
    %14 = arith.mulf %13, %12 : vector<128x128xf32>
    %15 = math.tanh %14 : vector<128x128xf32>
    %cst_8 = arith.constant 1.000000e+00 : f32
    %16 = vector.broadcast %cst_8 : f32 to vector<128x128xf32>
    %17 = arith.addf %16, %15 : vector<128x128xf32>
    %18 = arith.mulf %7, %17 : vector<128x128xf32>
    %19 = arith.truncf %18 : vector<128x128xf32> to vector<128x128xbf16>
    %c0_9 = arith.constant 0 : index
    %c0_10 = arith.constant 0 : index
    %20 = vector.load %arg6[%c0_9, %c0_10] : memref<128x128xbf16, #tpu.memory_space<vmem>>, vector<128x128xbf16>
    %cst_11 = arith.constant dense<0.000000e+00> : vector<128x128xf32>
    %21 = tpu.matmul %19, %20, %cst_11 {dimension_numbers = #tpu.dot_dimension_numbers<[1], [0], [0], [1], [0, 0, 1, 1], [], []>} : vector<128x128xbf16>, vector<128x128xbf16>, vector<128x128xf32> -> vector<128x128xf32>
    %c0_12 = arith.constant 0 : index
    %c0_13 = arith.constant 0 : index
    %22 = vector.load %arg7[%c0_12, %c0_13] : memref<1x128xf32, #tpu.memory_space<vmem>>, vector<1x128xf32>
    %23 = vector.broadcast %22 : vector<1x128xf32> to vector<128x128xf32>
    %24 = arith.addf %21, %23 : vector<128x128xf32>
    %cst_14 = arith.constant 5.000000e-01 : f32
    %25 = vector.broadcast %cst_14 : f32 to vector<128x128xf32>
    %26 = arith.mulf %25, %24 : vector<128x128xf32>
    %cst_15 = arith.constant 4.471500e-02 : f32
    %27 = vector.broadcast %cst_15 : f32 to vector<128x128xf32>
    %28 = arith.mulf %27, %24 : vector<128x128xf32>
    %29 = arith.mulf %28, %24 : vector<128x128xf32>
    %30 = arith.mulf %29, %24 : vector<128x128xf32>
    %31 = arith.addf %24, %30 : vector<128x128xf32>
    %cst_16 = arith.constant 0.797884583 : f32
    %32 = vector.broadcast %cst_16 : f32 to vector<128x128xf32>
    %33 = arith.mulf %32, %31 : vector<128x128xf32>
    %34 = math.tanh %33 : vector<128x128xf32>
    %cst_17 = arith.constant 1.000000e+00 : f32
    %35 = vector.broadcast %cst_17 : f32 to vector<128x128xf32>
    %36 = arith.addf %35, %34 : vector<128x128xf32>
    %37 = arith.mulf %26, %36 : vector<128x128xf32>
    %c0_i32 = arith.constant 0 : i32
    %c128_i32 = arith.constant 128 : i32
    %38 = arith.addi %c0_i32, %c128_i32 : i32
    %c1_i32 = arith.constant 1 : i32
    scf.for %arg10 = %c0_i32 to %38 step %c1_i32  : i32 {
      %c128_i32_23 = arith.constant 128 : i32
      %43 = arith.muli %arg0, %c128_i32_23 : i32
      %44 = arith.addi %43, %arg10 : i32
      %45 = arith.index_cast %44 : i32 to index
      %46 = memref.load %arg1[%45] : memref<256xi32, #tpu.memory_space<smem>>
      %47 = arith.index_cast %46 : i32 to index
      %c0_24 = arith.constant 0 : index
      %48 = vector.load %arg3[%47, %c0_24] : memref<16x128xf32, #tpu.memory_space<vmem>>, vector<1x128xf32>
      %49 = arith.index_cast %arg10 : i32 to index
      %c0_25 = arith.constant 0 : index
      %50 = vector.load %arg9[%49, %c0_25] : memref<128x128xf32, #tpu.memory_space<vmem>>, vector<1x128xf32>
      tpu.vector_store %arg9[%49, %c0_25], %48 {strides = array<i32>} : memref<128x128xf32, #tpu.memory_space<vmem>>, vector<1x128xf32>,
    }
    %c128_i32_18 = arith.constant 128 : i32
    %c0_19 = arith.constant 0 : index
    %c0_20 = arith.constant 0 : index
    %39 = vector.load %arg9[%c0_19, %c0_20] : memref<128x128xf32, #tpu.memory_space<vmem>>, vector<128x128xf32>
    %40 = arith.mulf %39, %37 : vector<128x128xf32>
    %41 = arith.truncf %40 : vector<128x128xf32> to vector<128x128xbf16>
    %c0_21 = arith.constant 0 : index
    %c0_22 = arith.constant 0 : index
    %42 = vector.load %arg8[%c0_21, %c0_22] : memref<128x128xbf16, #tpu.memory_space<vmem>>, vector<128x128xbf16>
    tpu.vector_store %arg8[%c0_21, %c0_22], %41 {strides = array<i32>} : memref<128x128xbf16, #tpu.memory_space<vmem>>, vector<128x128xbf16>,
    return
  }
  func.func @transform_0(%arg0: i32, %arg1: memref<256xi32, #tpu.memory_space<smem>>) -> (i32, i32) {
    %c0_i32 = arith.constant 0 : i32
    %c0_i32_0 = arith.constant 0 : i32
    return %arg0, %c0_i32 : i32, i32
  }
  func.func @transform_1(%arg0: i32, %arg1: memref<256xi32, #tpu.memory_space<smem>>) -> (i32, i32) {
    %c0_i32 = arith.constant 0 : i32
    %c0_i32_0 = arith.constant 0 : i32
    %c0_i32_1 = arith.constant 0 : i32
    return %c0_i32, %c0_i32_0 : i32, i32
  }
  func.func @transform_2(%arg0: i32, %arg1: memref<256xi32, #tpu.memory_space<smem>>) -> (i32, i32) {
    %c0_i32 = arith.constant 0 : i32
    %c0_i32_0 = arith.constant 0 : i32
    %c0_i32_1 = arith.constant 0 : i32
    return %c0_i32, %c0_i32_0 : i32, i32
  }
  func.func @transform_3(%arg0: i32, %arg1: memref<256xi32, #tpu.memory_space<smem>>) -> (i32, i32) {
    %c0_i32 = arith.constant 0 : i32
    %c0_i32_0 = arith.constant 0 : i32
    %c0_i32_1 = arith.constant 0 : i32
    return %c0_i32, %c0_i32_0 : i32, i32
  }
  func.func @transform_4(%arg0: i32, %arg1: memref<256xi32, #tpu.memory_space<smem>>) -> (i32, i32) {
    %c0_i32 = arith.constant 0 : i32
    %c0_i32_0 = arith.constant 0 : i32
    %c0_i32_1 = arith.constant 0 : i32
    return %c0_i32, %c0_i32_0 : i32, i32
  }
  func.func @transform_5(%arg0: i32, %arg1: memref<256xi32, #tpu.memory_space<smem>>) -> (i32, i32) {
    %c0_i32 = arith.constant 0 : i32
    %c0_i32_0 = arith.constant 0 : i32
    %c0_i32_1 = arith.constant 0 : i32
    return %c0_i32, %c0_i32_0 : i32, i32
  }
  func.func @transform_6(%arg0: i32, %arg1: memref<256xi32, #tpu.memory_space<smem>>) -> (i32, i32) {
    %c0_i32 = arith.constant 0 : i32
    %c0_i32_0 = arith.constant 0 : i32
    return %arg0, %c0_i32 : i32, i32
  }
}

module attributes {stable_mosaic.version = 11 : i64} {
  func.func @_aggr_ffn_kernel(%arg0: i32, %arg1: i32, %arg2: memref<1x128xi32, #tpu.memory_space<vmem>>, %arg3: memref<8x128xf32, #tpu.memory_space<vmem>>, %arg4: memref<128x128xbf16, #tpu.memory_space<vmem>>, %arg5: memref<128x128xbf16, #tpu.memory_space<vmem>>, %arg6: memref<1x128xf32, #tpu.memory_space<vmem>>, %arg7: memref<128x128xbf16, #tpu.memory_space<vmem>>, %arg8: memref<1x128xf32, #tpu.memory_space<vmem>>, %arg9: memref<8x128xf32, #tpu.memory_space<vmem>>, %arg10: memref<8x128xf32, #tpu.memory_space<vmem>>) attributes {dimension_semantics = [#tpu.dimension_semantics<parallel>, #tpu.dimension_semantics<arbitrary>], iteration_bounds = array<i64: 2, 2>, scalar_prefetch = 0 : i64, scratch_operands = 1 : i64, tpu.core_type = #tpu.core_type<tc>, window_params = [{transform_indices = @transform_0, window_bounds = array<i64: 1, 128>}, {transform_indices = @transform_1, window_bounds = array<i64: 8, 128>}, {transform_indices = @transform_2, window_bounds = array<i64: 128, 128>}, {pipeline_mode = #tpu.pipeline_mode<synchronous>, transform_indices = @transform_3, window_bounds = array<i64: 128, 128>}, {pipeline_mode = #tpu.pipeline_mode<synchronous>, transform_indices = @transform_4, window_bounds = array<i64: 1, 128>}, {pipeline_mode = #tpu.pipeline_mode<synchronous>, transform_indices = @transform_5, window_bounds = array<i64: 128, 128>}, {pipeline_mode = #tpu.pipeline_mode<synchronous>, transform_indices = @transform_6, window_bounds = array<i64: 1, 128>}, {transform_indices = @transform_7, window_bounds = array<i64: 8, 128>}]} {
    %c0_i32 = arith.constant 0 : i32
    %0 = arith.cmpi eq, %arg1, %c0_i32 : i32
    %1 = arith.extui %0 : i1 to i32
    %c0_i32_0 = arith.constant 0 : i32
    %2 = arith.cmpi ne, %1, %c0_i32_0 : i32
    scf.if %2 {
      %cst_11 = arith.constant 0.000000e+00 : f32
      %22 = vector.broadcast %cst_11 : f32 to vector<8x128xf32>
      %c0_12 = arith.constant 0 : index
      %c0_13 = arith.constant 0 : index
      %23 = vector.load %arg10[%c0_12, %c0_13] : memref<8x128xf32, #tpu.memory_space<vmem>>, vector<8x128xf32>
      tpu.vector_store %arg10[%c0_12, %c0_13], %22 {strides = array<i32>} : memref<8x128xf32, #tpu.memory_space<vmem>>, vector<8x128xf32>,
    } else {
    }
    %c8_i32 = arith.constant 8 : i32
    %3 = arith.muli %arg0, %c8_i32 : i32
    %4 = tpu.iota {dimensions = array<i32: 0>} : vector<8x128xi32>
    %5 = vector.broadcast %3 : i32 to vector<8x128xi32>
    %6 = arith.addi %5, %4 : vector<8x128xi32>
    %c0 = arith.constant 0 : index
    %c0_1 = arith.constant 0 : index
    %7 = vector.load %arg2[%c0, %c0_1] : memref<1x128xi32, #tpu.memory_space<vmem>>, vector<1x128xi32>
    %8 = vector.broadcast %7 : vector<1x128xi32> to vector<8x128xi32>
    %9 = arith.cmpi eq, %6, %8 : vector<8x128xi32>
    %cst = arith.constant 1.000000e+00 : f32
    %cst_2 = arith.constant 0.000000e+00 : f32
    %10 = vector.broadcast %cst : f32 to vector<8x128xf32>
    %11 = vector.broadcast %cst_2 : f32 to vector<8x128xf32>
    %12 = arith.select %9, %10, %11 : vector<8x128xi1>, vector<8x128xf32>
    %13 = arith.truncf %12 : vector<8x128xf32> to vector<8x128xbf16>
    %c0_3 = arith.constant 0 : index
    %c0_4 = arith.constant 0 : index
    %14 = vector.load %arg10[%c0_3, %c0_4] : memref<8x128xf32, #tpu.memory_space<vmem>>, vector<8x128xf32>
    %c0_5 = arith.constant 0 : index
    %c0_6 = arith.constant 0 : index
    %15 = vector.load %arg4[%c0_5, %c0_6] : memref<128x128xbf16, #tpu.memory_space<vmem>>, vector<128x128xbf16>
    %cst_7 = arith.constant dense<0.000000e+00> : vector<8x128xf32>
    %16 = tpu.matmul %13, %15, %cst_7 {dimension_numbers = #tpu.dot_dimension_numbers<[1], [0], [0], [1], [0, 0, 1, 1], [], []>} : vector<8x128xbf16>, vector<128x128xbf16>, vector<8x128xf32> -> vector<8x128xf32>
    %17 = arith.addf %14, %16 : vector<8x128xf32>
    %c0_8 = arith.constant 0 : index
    %c0_9 = arith.constant 0 : index
    %18 = vector.load %arg10[%c0_8, %c0_9] : memref<8x128xf32, #tpu.memory_space<vmem>>, vector<8x128xf32>
    tpu.vector_store %arg10[%c0_8, %c0_9], %17 {strides = array<i32>} : memref<8x128xf32, #tpu.memory_space<vmem>>, vector<8x128xf32>,
    %c1_i32 = arith.constant 1 : i32
    %19 = arith.cmpi eq, %arg1, %c1_i32 : i32
    %20 = arith.extui %19 : i1 to i32
    %c0_i32_10 = arith.constant 0 : i32
    %21 = arith.cmpi ne, %20, %c0_i32_10 : i32
    scf.if %21 {
      %c0_11 = arith.constant 0 : index
      %c0_12 = arith.constant 0 : index
      %22 = vector.load %arg3[%c0_11, %c0_12] : memref<8x128xf32, #tpu.memory_space<vmem>>, vector<8x128xf32>
      %c0_13 = arith.constant 0 : index
      %c0_14 = arith.constant 0 : index
      %23 = vector.load %arg10[%c0_13, %c0_14] : memref<8x128xf32, #tpu.memory_space<vmem>>, vector<8x128xf32>
      %24 = arith.addf %22, %23 : vector<8x128xf32>
      %25 = arith.truncf %24 : vector<8x128xf32> to vector<8x128xbf16>
      %c0_15 = arith.constant 0 : index
      %c0_16 = arith.constant 0 : index
      %26 = vector.load %arg5[%c0_15, %c0_16] : memref<128x128xbf16, #tpu.memory_space<vmem>>, vector<128x128xbf16>
      %cst_17 = arith.constant dense<0.000000e+00> : vector<8x128xf32>
      %27 = tpu.matmul %25, %26, %cst_17 {dimension_numbers = #tpu.dot_dimension_numbers<[1], [0], [0], [1], [0, 0, 1, 1], [], []>} : vector<8x128xbf16>, vector<128x128xbf16>, vector<8x128xf32> -> vector<8x128xf32>
      %c0_18 = arith.constant 0 : index
      %c0_19 = arith.constant 0 : index
      %28 = vector.load %arg6[%c0_18, %c0_19] : memref<1x128xf32, #tpu.memory_space<vmem>>, vector<1x128xf32>
      %29 = vector.broadcast %28 : vector<1x128xf32> to vector<8x128xf32>
      %30 = arith.addf %27, %29 : vector<8x128xf32>
      %cst_20 = arith.constant 5.000000e-01 : f32
      %31 = vector.broadcast %cst_20 : f32 to vector<8x128xf32>
      %32 = arith.mulf %31, %30 : vector<8x128xf32>
      %cst_21 = arith.constant 4.471500e-02 : f32
      %33 = vector.broadcast %cst_21 : f32 to vector<8x128xf32>
      %34 = arith.mulf %33, %30 : vector<8x128xf32>
      %35 = arith.mulf %34, %30 : vector<8x128xf32>
      %36 = arith.mulf %35, %30 : vector<8x128xf32>
      %37 = arith.addf %30, %36 : vector<8x128xf32>
      %cst_22 = arith.constant 0.797884583 : f32
      %38 = vector.broadcast %cst_22 : f32 to vector<8x128xf32>
      %39 = arith.mulf %38, %37 : vector<8x128xf32>
      %40 = math.tanh %39 : vector<8x128xf32>
      %cst_23 = arith.constant 1.000000e+00 : f32
      %41 = vector.broadcast %cst_23 : f32 to vector<8x128xf32>
      %42 = arith.addf %41, %40 : vector<8x128xf32>
      %43 = arith.mulf %32, %42 : vector<8x128xf32>
      %44 = arith.truncf %43 : vector<8x128xf32> to vector<8x128xbf16>
      %c0_24 = arith.constant 0 : index
      %c0_25 = arith.constant 0 : index
      %45 = vector.load %arg7[%c0_24, %c0_25] : memref<128x128xbf16, #tpu.memory_space<vmem>>, vector<128x128xbf16>
      %cst_26 = arith.constant dense<0.000000e+00> : vector<8x128xf32>
      %46 = tpu.matmul %44, %45, %cst_26 {dimension_numbers = #tpu.dot_dimension_numbers<[1], [0], [0], [1], [0, 0, 1, 1], [], []>} : vector<8x128xbf16>, vector<128x128xbf16>, vector<8x128xf32> -> vector<8x128xf32>
      %c0_27 = arith.constant 0 : index
      %c0_28 = arith.constant 0 : index
      %47 = vector.load %arg8[%c0_27, %c0_28] : memref<1x128xf32, #tpu.memory_space<vmem>>, vector<1x128xf32>
      %48 = vector.broadcast %47 : vector<1x128xf32> to vector<8x128xf32>
      %49 = arith.addf %46, %48 : vector<8x128xf32>
      %cst_29 = arith.constant 5.000000e-01 : f32
      %50 = vector.broadcast %cst_29 : f32 to vector<8x128xf32>
      %51 = arith.mulf %50, %49 : vector<8x128xf32>
      %cst_30 = arith.constant 4.471500e-02 : f32
      %52 = vector.broadcast %cst_30 : f32 to vector<8x128xf32>
      %53 = arith.mulf %52, %49 : vector<8x128xf32>
      %54 = arith.mulf %53, %49 : vector<8x128xf32>
      %55 = arith.mulf %54, %49 : vector<8x128xf32>
      %56 = arith.addf %49, %55 : vector<8x128xf32>
      %cst_31 = arith.constant 0.797884583 : f32
      %57 = vector.broadcast %cst_31 : f32 to vector<8x128xf32>
      %58 = arith.mulf %57, %56 : vector<8x128xf32>
      %59 = math.tanh %58 : vector<8x128xf32>
      %cst_32 = arith.constant 1.000000e+00 : f32
      %60 = vector.broadcast %cst_32 : f32 to vector<8x128xf32>
      %61 = arith.addf %60, %59 : vector<8x128xf32>
      %62 = arith.mulf %51, %61 : vector<8x128xf32>
      %63 = arith.addf %24, %62 : vector<8x128xf32>
      %c0_33 = arith.constant 0 : index
      %c0_34 = arith.constant 0 : index
      %64 = vector.load %arg9[%c0_33, %c0_34] : memref<8x128xf32, #tpu.memory_space<vmem>>, vector<8x128xf32>
      tpu.vector_store %arg9[%c0_33, %c0_34], %63 {strides = array<i32>} : memref<8x128xf32, #tpu.memory_space<vmem>>, vector<8x128xf32>,
    } else {
    }
    return
  }
  func.func @transform_0(%arg0: i32, %arg1: i32) -> (i32, i32) {
    %c0_i32 = arith.constant 0 : i32
    %c0_i32_0 = arith.constant 0 : i32
    return %c0_i32, %arg1 : i32, i32
  }
  func.func @transform_1(%arg0: i32, %arg1: i32) -> (i32, i32) {
    %c0_i32 = arith.constant 0 : i32
    %c0_i32_0 = arith.constant 0 : i32
    return %arg0, %c0_i32 : i32, i32
  }
  func.func @transform_2(%arg0: i32, %arg1: i32) -> (i32, i32) {
    %c0_i32 = arith.constant 0 : i32
    %c0_i32_0 = arith.constant 0 : i32
    return %arg1, %c0_i32 : i32, i32
  }
  func.func @transform_3(%arg0: i32, %arg1: i32) -> (i32, i32) {
    %c0_i32 = arith.constant 0 : i32
    %c0_i32_0 = arith.constant 0 : i32
    %c0_i32_1 = arith.constant 0 : i32
    return %c0_i32, %c0_i32_0 : i32, i32
  }
  func.func @transform_4(%arg0: i32, %arg1: i32) -> (i32, i32) {
    %c0_i32 = arith.constant 0 : i32
    %c0_i32_0 = arith.constant 0 : i32
    %c0_i32_1 = arith.constant 0 : i32
    return %c0_i32, %c0_i32_0 : i32, i32
  }
  func.func @transform_5(%arg0: i32, %arg1: i32) -> (i32, i32) {
    %c0_i32 = arith.constant 0 : i32
    %c0_i32_0 = arith.constant 0 : i32
    %c0_i32_1 = arith.constant 0 : i32
    return %c0_i32, %c0_i32_0 : i32, i32
  }
  func.func @transform_6(%arg0: i32, %arg1: i32) -> (i32, i32) {
    %c0_i32 = arith.constant 0 : i32
    %c0_i32_0 = arith.constant 0 : i32
    %c0_i32_1 = arith.constant 0 : i32
    return %c0_i32, %c0_i32_0 : i32, i32
  }
  func.func @transform_7(%arg0: i32, %arg1: i32) -> (i32, i32) {
    %c0_i32 = arith.constant 0 : i32
    %c0_i32_0 = arith.constant 0 : i32
    return %arg0, %c0_i32 : i32, i32
  }
}

</mosaic_0001>

<bundles_post_ra>
// kernel: convl_forward.3
= control target key start
LH: loop header
LB: loop body
LE: loop exit
PB: predicated region body
PF: predicated region fallthrough
CT: control target
= control target key end

     0   :  { %s440_s12 = smov 0   ;;  %s487_s0 = inlined_call_operand.vmem [shape: f32[16,128], index: 0, kind: input, shape index: {}]   ;;  %s488_s1 = inlined_call_operand.vmem [shape: bf16[128,128], index: 1, kind: input, shape index: {}]   ;;  %s489_s2 = inlined_call_operand.vmem [shape: f32[1,128], index: 2, kind: input, shape index: {}]   ;;  %s490_s3 = inlined_call_operand.vmem [shape: f32[16,128], index: 3, kind: output, shape index: {}]  }
   0x1 LB: > { %s343_s13 = sadd.s32 4294967295, %s416_s12   ;;  %p347_p0 = scmp.ge.s32.totalorder %s416_s12, 1  ;;  %s416_s12 = sphi %s440_s12, %s13_s12  }
   0x2   : > { %p136_p1 = scmp.lt.s32.totalorder %s416_s12, 3 }
   0x4   : > { %p137_p2 = pnand %p347_p0, %p136_p1 }
   0x5   : > { %v400_v0 = vld [vmem:[%s488_s1] sm:$0xff] (!%p137_p2)   ;;  %v418_v1 = vmov (!%p137_p2), 0.0   ;;  %v401_v2 = vld [vmem:[%s488_s1 + $0x8] sm:$0xff] (!%p137_p2)   ;;  %vm419_vm0 = vmmov (!%p137_p2), 0   ;;  %v402_v3 = vld [vmem:[%s488_s1 + $0x10] sm:$0xff] (!%p137_p2)   ;;  %p158_p3 = scmp.lt.s32.totalorder (!%p137_p2), %s343_s13, 1 }
   0x6   : > { %140 = sbr.rel (%p137_p2) target bundleno = 278 (0x116), region = 32  ;;  %370 = vmatprep.subr.bf16.mxu0 (!%p137_p2), %v418_v1  ;;  %386 = vmatprep.mubr.msk.bf16.mxu0 (!%p137_p2), %vm419_vm0, %v418_v1  ;;  %v403_v4 = vld [vmem:[%s488_s1 + $0x18] sm:$0xff] (!%p137_p2)   ;;  %v404_v5 = vld [vmem:[%s488_s1 + $0x20] sm:$0xff] (!%p137_p2)   ;;  %v405_v6 = vld [vmem:[%s488_s1 + $0x28] sm:$0xff] (!%p137_p2)  }
   0x7   : > { %371 = vmatpush3.bf16.msra.mxu0 (!%p137_p2), %v400_v0  ;;  %v406_v7 = vld [vmem:[%s488_s1 + $0x30] sm:$0xff] (!%p137_p2)   ;;  %v407_v8 = vld [vmem:[%s488_s1 + $0x38] sm:$0xff] (!%p137_p2)   ;;  %v350_v11 = vld [vmem:[%s489_s2] ss:$0 sm:$0xff] (!%p137_p2) }
   0x8   : > { %372 = vmatprep.subr.bf16.mxu0 (!%p137_p2), %v418_v1 }
   0xb   : > { %373 = vmatpush3.bf16.msra.mxu0 (!%p137_p2), %v401_v2 }
   0xc   : > { %374 = vmatprep.subr.bf16.mxu0 (!%p137_p2), %v418_v1 }
   0xd   : > { %s492_s13 = smov (!%p158_p3, %s343_s13), 1 }
   0xe   : > { %s348_s26 = sshll.u32 %s492_s13, 3 }
   0xf   : > { %375 = vmatpush3.bf16.msra.mxu0 %v402_v3  ;;  %s161_s4 = scalar_lea.vmem %s487_s0, %s348_s26  ;;  %s165_s11 = scalar_lea.vmem %s490_s3, %s348_s26 }
  0x10   : > { %376 = vmatprep.subr.bf16.mxu0 %v418_v1  ;;  %v167_v9 = vld [vmem:[%s161_s4] sm:$0xff] }
  0x11   : > { %v168_v10 = vpack.c.bf16 %v167_v9, %v167_v9 }
  0x13   : > { %377 = vmatpush3.bf16.msra.mxu0 %v403_v4 }
  0x14   : > { %378 = vmatprep.subr.bf16.mxu0 %v418_v1 }
  0x17   : > { %379 = vmatpush3.bf16.msra.mxu0 %v404_v5 }
  0x18   : > { %380 = vmatprep.subr.bf16.mxu0 %v418_v1 }
  0x1b   : > { %381 = vmatpush3.bf16.msra.mxu0 %v405_v6 }
  0x1c   : > { %382 = vmatprep.subr.bf16.mxu0 %v418_v1 }
  0x1f   : > { %383 = vmatpush3.bf16.msra.mxu0 %v406_v7 }
  0x20   : > { %384 = vmatprep.subr.bf16.mxu0 %v418_v1 }
  0x23   : > { %385 = vmatpush3.bf16.msra.mxu0 %v407_v8 }
  0x26   : > { %387 = vmatmul.mubr.bf16.vlgmr.msra.gmra.mrb[0].mxu0 %v168_v10 }
  0xf9   : > { %v274_v12 = vpop.f32.mrb[0].mxu0 }
  0xfa   : > { %v275_v13 = vadd.f32 %v350_v11, %v274_v12  ;;  %v388_v14 = vpop.f32.mrb[1].mxu0 }
  0xfb   : > { %v277_v15 = vpop.f32.mrb[2].mxu0 }
  0xfc   : > { %v281_v16 = vmul.f32 0.044715, %v275_v13  ;;  %v389_v17 = vpop.f32.mrb[3].mxu0  ;;  %v280_v23 = vmul.f32 0.5, %v275_v13 }
  0xfe   : > { %v282_v18 = vmul.f32 %v281_v16, %v275_v13 }
 0x100   : > { %v283_v19 = vmul.f32 %v282_v18, %v275_v13 }
 0x102   : > { %v284_v20 = vadd.f32 %v283_v19, %v275_v13 }
 0x104   : > { %v285_v21 = vmul.f32 0.7978846, %v284_v20 }
 0x106   : > { %408 = vtanh.f32 %v285_v21 }
 0x110   : > { %v409_v22 = vpop.eup %408 }
 0x111   : > { %v287_v24 = vadd.f32 1.0, %v409_v22 }
 0x113   : > { %v288_v25 = vmul.f32 %v287_v24, %v280_v23 }
 0x115   : > { %289 = vst [vmem:[%s165_s11] sm:$0xff] %v288_v25 }
 0x116 PF: > { %s13_s12 = sadd.s32 1, %s416_s12  }
 0x117   : > { %p10_p4 = scmp.ge.s32.totalorder %s13_s12, 4  }
 0x119   :  { %12 = sbr.rel (!%p10_p4) target bundleno = 1 (0x1), region = 62 }

// kernel: convl_forward.5
= control target key start
LH: loop header
LB: loop body
LE: loop exit
PB: predicated region body
PF: predicated region fallthrough
CT: control target
= control target key end

     0   :  { %12 = vsyncpa [#allocation4], 0  ;;  %s1408_s0 = inlined_call_operand.vmem [shape: s32[1,256], index: 0, kind: input, shape index: {}]   ;;  %s1409_s1 = inlined_call_operand.vmem [shape: f32[16,128], index: 1, kind: input, shape index: {}]   ;;  %s1410_s2 = inlined_call_operand.vmem [shape: bf16[256,128], index: 2, kind: input, shape index: {}]   ;;  %s1411_s3 = inlined_call_operand.vmem [shape: bf16[128,128], index: 3, kind: input, shape index: {}]   ;;  %s1412_s4 = inlined_call_operand.vmem [shape: f32[1,128], index: 4, kind: input, shape index: {}]   ;;  %s1413_s5 = inlined_call_operand.vmem [shape: bf16[128,128], index: 5, kind: input, shape index: {}]   ;;  %s1414_s6 = inlined_call_operand.vmem [shape: f32[1,128], index: 6, kind: input, shape index: {}]   ;;  %s1415_s7 = inlined_call_operand.hbm [shape: f32[16,128], index: 7, kind: output, shape index: {}]  }
   0x1   :  { %14 = vsyncpa [#allocation4 + $0x1], 0  ;;  %s1184_s24 = smov 0   ;;  %s1186_s25 = smov 0  }
   0x2   :  { %s1188_s26 = smov 0   ;;  %s1190_s27 = smov 0  }
   0x3   :  { %s1192_s28 = smov 0   ;;  %s1194_s29 = smov 0  }
   0x4   :  { %s1196_s30 = smov 0   ;;  %s1198_s8 = smov 0  }
   0x5 LB: > { %1421 = sst [smem:[#allocation6_spill]] %s1115_s26  ;;  %s804_s9 = sadd.s32 4294967295, %s1135_s8   ;;  %s1135_s8 = sphi %s1198_s8, %s20_s8   ;;  %s1131_s30 = sphi %s1196_s30, %s1435_s30   ;;  %s1127_s29 = sphi %s1194_s29, %s1434_s29   ;;  %s1123_s28 = sphi %s1192_s28, %s1433_s28   ;;  %s1119_s27 = sphi %s1190_s27, %s1432_s27   ;;  %s1115_s26 = sphi %s1188_s26, %s1431_s26   ;;  %s1111_s25 = sphi %s1186_s25, %s1437_s25   ;;  %s1107_s24 = sphi %s1184_s24, %s1436_s24  }
   0x6   : > { %1422 = sst [smem:[#allocation7_spill]] %s1127_s29  ;;  %s805_s10 = sadd.s32 4294967294, %s1135_s8  }
   0x7   : > { %1423 = sst [smem:[#allocation8_spill]] %s1131_s30  ;;  %s29_s11 = sadd.s32 1, %s1127_s29 }
   0x8   : > { %p30_p0 = scmp.ge.s32.totalorder %s29_s11, 2  ;;  %s32_s12 = sadd.s32 1, %s1131_s30 }
   0x9   : > { %p211_p1 = scmp.ne.s32.totalorder %s1115_s26, %s1111_s25  ;;  %p212_p2 = scmp.eq.s32.totalorder %s804_s9, 3 }
   0xa   : > { %s1439_s11 = smov (%p30_p0, %s29_s11), 0  ;;  %s1441_s12 = smov (!%p30_p0, %s32_s12), %s1131_s30 }
   0xb   : > { %1424 = sst [smem:[#allocation9_spill]] %s1439_s11  ;;  %p1233_p3 = por %p212_p2, %p211_p1 }
   0xc   : > { %p217_p4 = scmp.ne.s32.totalorder %s1111_s25, %s1107_s24  ;;  %p34_p5 = scmp.ge.s32.totalorder %s1441_s12, 2 }
   0xd   : > { %p218_p6 = scmp.eq.s32.totalorder %s805_s10, 3  ;;  %p808_p7 = scmp.ge.s32.totalorder %s1135_s8, 1 }
   0xe   : > { %p270_p8 = scmp.lt.s32.totalorder %s1135_s8, 5  ;;  %s1443_s12 = smov (%p34_p5, %s1441_s12), 0 }
   0xf   : > { %1426 = sst [smem:[#allocation10_spill]] %s1443_s12  ;;  %p1243_p9 = por %p218_p6, %p217_p4 }
  0x10   : > { %p271_p10 = pnand %p808_p7, %p270_p8  ;;  %s198_s15 = ssub.s32 %s1131_s30, %s1443_s12 }
  0x11   : > { %s201_s16 = sadd.s32 1, %s1115_s26  ;;  %p199_p11 = scmp.eq.s32.totalorder %s198_s15, 0 }
  0x12   : > { %274 = sbr.rel (%p271_p10) target bundleno = 804 (0x324), region = 48  ;;  %s1417_s18 = sand.u32 (!%p271_p10), 1, %s1111_s25  }
  0x13   : > { %s1251_s17 = scalar_select %p199_p11, %s1115_s26, %s201_s16  }
  0x14   : > { %p309_p12 = scmp.lt.s32.totalorder (!%p271_p10), %s1119_s27, 1  ;;  %s1257_s19 = sshll.u32 (!%p271_p10), %s1417_s18, 3 }
  0x15   : > { %1428 = sst [smem:[#allocation11_spill]] %s1251_s17  ;;  %p312_p13 = scmp.lt.s32.totalorder (!%p271_p10), %s1123_s28, 1 }
  0x16   : > { %s811_s20 = sshll.u32 (!%p271_p10), %s1119_s27, 4  ;;  %s308_s26 = scalar_lea.vmem (!%p271_p10), [#allocation3], %s1257_s19 }
  0x17   : > { %p317_p0 = scmp.lt.s32.totalorder (!%p271_p10), %s811_s20, 31  ;;  %p813_p1 = scmp.ne.s32.totalorder (!%p271_p10), %s1119_s27, 0 }
  0x19   : > { %s1262_s21 = scalar_select %p309_p12, %s1119_s27, 1 }
  0x1a   : > { %s313_s22 = scalar_select %p312_p13, %s1123_s28, 1 }
  0x1b   : > { %s311_s10 = scalar_lea.vmem %s1408_s0, %s1262_s21  ;;  %s1445_s20 = smov (!%p317_p0, %s811_s20), 31  ;;  %v1137_v0 = vmov (!%p813_p1), 0.0  }
  0x1c   : > { %s810_s15 = sshll.u32 %s313_s22, 3  ;;  %s812_s18 = sshll.u32 %s1445_s20, 2  ;;  %327 = vst [vmem:[#allocation2] sm:$0xff] (!%p813_p1), %v1137_v0 }
  0x1d   : > { %s1272_s11 = scalar_lea.vmem %s1409_s1, %s810_s15  ;;  %s1277_s17 = scalar_lea.vmem %s1410_s2, %s812_s18 }
  0x1e   : > { %326 = sbr.rel (%p813_p1) target bundleno = 37 (0x25), region = 52 }
  0x25 PF: > { %v1013_v1 = vld [vmem:[%s1277_s17] sm:$0xff]   ;;  %v1138_v2 = vmov 0.0   ;;  %v1014_v3 = vld [vmem:[%s1277_s17 + $0x8] sm:$0xff]   ;;  %vm1139_vm0 = vmmov 0   ;;  %v1015_v4 = vld [vmem:[%s1277_s17 + $0x10] sm:$0xff]   ;;  %v329_v7 = vlaneseq  ;;  %s814_s29 = sshll.u32 %s1123_s28, 3 }
  0x26   : > { %876 = vmatprep.subr.bf16.mxu0 %v1138_v2  ;;  %892 = vmatprep.mubr.msk.bf16.mxu0 %vm1139_vm0, %v1138_v2  ;;  %v1016_v5 = vld [vmem:[%s1277_s17 + $0x18] sm:$0xff]   ;;  %v1017_v6 = vld [vmem:[%s1277_s17 + $0x20] sm:$0xff]   ;;  %v1018_v8 = vld [vmem:[%s1277_s17 + $0x28] sm:$0xff]   ;;  %v331_v10 = vstv %s814_s29  ;;  %v1140_v15 = vmov 1.0|1.0   ;;  %p826_p2 = scmp.ne.s32.totalorder %s1119_s27, 1 }
  0x27   : > { %877 = vmatpush3.bf16.msra.mxu0 %v1013_v1  ;;  %v330_v9 = vshrl.u32 %v329_v7, 7  ;;  %v1019_v11 = vld [vmem:[%s1277_s17 + $0x30] sm:$0xff]   ;;  %v815_v13 = vld [vmem:[%s311_s10] ss:$0 sm:$0xff]  ;;  %v1020_v14 = vld [vmem:[%s1277_s17 + $0x38] sm:$0xff]   ;;  %v1141_v23 = vmov (!%p826_p2), 0.0  }
  0x28   : > { %878 = vmatprep.subr.bf16.mxu0 %v1138_v2  ;;  %v341_v16 = vld [vmem:[#allocation2] sm:$0xff]  ;;  %916 = vmatprep.subr.bf16.mxu1 (!%p826_p2), %v1141_v23  ;;  %v1022_v24 = vld [vmem:[%s1411_s3 + $0x8] sm:$0xff] (!%p826_p2)   ;;  %vm1142_vm3 = vmmov (!%p826_p2), 0   ;;  %v1023_v25 = vld [vmem:[%s1411_s3 + $0x10] sm:$0xff] (!%p826_p2)  }
  0x29   : > { %v332_v12 = vadd.s32 %v331_v10, %v330_v9  ;;  %v1021_v22 = vld [vmem:[%s1411_s3] sm:$0xff] (!%p826_p2)   ;;  %932 = vmatprep.mubr.msk.bf16.mxu1 (!%p826_p2), %vm1142_vm3, %v1141_v23  ;;  %v1024_v26 = vld [vmem:[%s1411_s3 + $0x18] sm:$0xff] (!%p826_p2)   ;;  %v1026_v29 = vld [vmem:[%s1411_s3 + $0x28] sm:$0xff] (!%p826_p2)  }
  0x2a   : > { %v1029_v27 = vld [vmem:[%s1413_s5] sm:$0xff] (!%p826_p2)   ;;  %v1027_v30 = vld [vmem:[%s1411_s3 + $0x30] sm:$0xff] (!%p826_p2)   ;;  %v1028_v34 = vld [vmem:[%s1411_s3 + $0x38] sm:$0xff] (!%p826_p2)  }
  0x2b   : > { %879 = vmatpush3.bf16.msra.mxu0 %v1014_v3  ;;  %vm338_vm1 = vcmp.eq.s32.totalorder %v332_v12, %v815_v13  ;;  %917 = vmatpush3.bf16.msra.mxu1 (!%p826_p2), %v1029_v27  ;;  %v1025_v28 = vld [vmem:[%s1411_s3 + $0x20] sm:$0xff] (!%p826_p2)   ;;  %v1030_v36 = vld [vmem:[%s1413_s5 + $0x8] sm:$0xff] (!%p826_p2)   ;;  %v1031_v37 = vld [vmem:[%s1413_s5 + $0x10] sm:$0xff] (!%p826_p2)  }
  0x2c   : > { %880 = vmatprep.subr.bf16.mxu0 %v1138_v2  ;;  %vm824_vm2 = vmpackc.low %vm338_vm1, %vm338_vm1  ;;  %918 = vmatprep.subr.bf16.mxu1 (!%p826_p2), %v1141_v23  ;;  %v452_v31 = vld [vmem:[%s1272_s11] sm:$0xff] (!%p826_p2)  ;;  %v1032_v38 = vld [vmem:[%s1413_s5 + $0x18] sm:$0xff] (!%p826_p2)  }
  0x2d   : > { %v1033_v39 = vld [vmem:[%s1413_s5 + $0x20] sm:$0xff] (!%p826_p2)   ;;  %v1034_v40 = vld [vmem:[%s1413_s5 + $0x28] sm:$0xff] (!%p826_p2)   ;;  %v1035_v41 = vld [vmem:[%s1413_s5 + $0x30] sm:$0xff] (!%p826_p2)  }
  0x2e   : > { %v1036_v42 = vld [vmem:[%s1413_s5 + $0x38] sm:$0xff] (!%p826_p2)   ;;  %v827_v43 = vld [vmem:[%s1412_s4] ss:$0 sm:$0xff] (!%p826_p2) }
  0x2f   : > { %881 = vmatpush3.bf16.msra.mxu0 %v1015_v4  ;;  %919 = vmatpush3.bf16.msra.mxu1 (!%p826_p2), %v1030_v36  ;;  %v836_v59 = vld [vmem:[%s1414_s6] ss:$0 sm:$0xff] (!%p826_p2) }
  0x30   : > { %882 = vmatprep.subr.bf16.mxu0 %v1138_v2  ;;  %920 = vmatprep.subr.bf16.mxu1 (!%p826_p2), %v1141_v23 }
  0x33   : > { %883 = vmatpush3.bf16.msra.mxu0 %v1016_v5  ;;  %921 = vmatpush3.bf16.msra.mxu1 (!%p826_p2), %v1031_v37 }
  0x34   : > { %884 = vmatprep.subr.bf16.mxu0 %v1138_v2  ;;  %922 = vmatprep.subr.bf16.mxu1 (!%p826_p2), %v1141_v23 }
  0x37   : > { %885 = vmatpush3.bf16.msra.mxu0 %v1017_v6  ;;  %923 = vmatpush3.bf16.msra.mxu1 (!%p826_p2), %v1032_v38 }
  0x38   : > { %886 = vmatprep.subr.bf16.mxu0 %v1138_v2  ;;  %924 = vmatprep.subr.bf16.mxu1 (!%p826_p2), %v1141_v23 }
  0x3b   : > { %887 = vmatpush3.bf16.msra.mxu0 %v1018_v8  ;;  %925 = vmatpush3.bf16.msra.mxu1 (!%p826_p2), %v1033_v39 }
  0x3c   : > { %888 = vmatprep.subr.bf16.mxu0 %v1138_v2  ;;  %926 = vmatprep.subr.bf16.mxu1 (!%p826_p2), %v1141_v23 }
  0x3f   : > { %889 = vmatpush3.bf16.msra.mxu0 %v1019_v11  ;;  %927 = vmatpush3.bf16.msra.mxu1 (!%p826_p2), %v1034_v40 }
  0x40   : > { %890 = vmatprep.subr.bf16.mxu0 %v1138_v2  ;;  %928 = vmatprep.subr.bf16.mxu1 (!%p826_p2), %v1141_v23 }
  0x43   : > { %891 = vmatpush3.bf16.msra.mxu0 %v1020_v14  ;;  %929 = vmatpush3.bf16.msra.mxu1 (!%p826_p2), %v1035_v41 }
  0x44   : > { %896 = vmatprep.subr.bf16.mxu0 (!%p826_p2), %v1141_v23  ;;  %930 = vmatprep.subr.bf16.mxu1 (!%p826_p2), %v1141_v23 }
  0x46   : > { %893 = vmatmul.mubr.msk.bf16.vlgmr.msra.gmra.mrb[0].mxu0 %vm824_vm2, %v1140_v15 }
  0x47   : > { %897 = vmatpush3.bf16.msra.mxu0 (!%p826_p2), %v1021_v22  ;;  %912 = vmatprep.mubr.msk.bf16.mxu0 (!%p826_p2), %vm1142_vm3, %v1141_v23 }
  0x48   : > { %898 = vmatprep.subr.bf16.mxu0 (!%p826_p2), %v1141_v23  ;;  %931 = vmatpush3.bf16.msra.mxu1 (!%p826_p2), %v1036_v42 }
  0x4b   : > { %899 = vmatpush3.bf16.msra.mxu0 (!%p826_p2), %v1022_v24 }
  0x4c   : > { %900 = vmatprep.subr.bf16.mxu0 (!%p826_p2), %v1141_v23 }
  0x4f   : > { %901 = vmatpush3.bf16.msra.mxu0 (!%p826_p2), %v1023_v25 }
  0x50   : > { %902 = vmatprep.subr.bf16.mxu0 (!%p826_p2), %v1141_v23 }
  0x53   : > { %903 = vmatpush3.bf16.msra.mxu0 (!%p826_p2), %v1024_v26 }
  0x54   : > { %904 = vmatprep.subr.bf16.mxu0 (!%p826_p2), %v1141_v23 }
  0x57   : > { %905 = vmatpush3.bf16.msra.mxu0 (!%p826_p2), %v1025_v28 }
  0x58   : > { %906 = vmatprep.subr.bf16.mxu0 (!%p826_p2), %v1141_v23 }
  0x5b   : > { %907 = vmatpush3.bf16.msra.mxu0 (!%p826_p2), %v1026_v29 }
  0x5c   : > { %908 = vmatprep.subr.bf16.mxu0 (!%p826_p2), %v1141_v23 }
  0x5f   : > { %909 = vmatpush3.bf16.msra.mxu0 (!%p826_p2), %v1027_v30 }
  0x60   : > { %910 = vmatprep.subr.bf16.mxu0 (!%p826_p2), %v1141_v23 }
  0x63   : > { %911 = vmatpush3.bf16.msra.mxu0 (!%p826_p2), %v1028_v34 }
 0x116   : > { %451 = sbr.rel (%p826_p2) target bundleno = 779 (0x30b), region = 56 }
 0x119   : > { %v440_v17 = vpop.f32.mrb[0].mxu0 }
 0x11a   : > { %v446_v18 = vadd.f32 %v440_v17, %v341_v16  ;;  %v894_v19 = vpop.f32.mrb[1].mxu0 }
 0x11b   : > { %v443_v20 = vpop.f32.mrb[2].mxu0 }
 0x11c   : > { %447 = vst [vmem:[#allocation2] sm:$0xff] %v446_v18  ;;  %v895_v21 = vpop.f32.mrb[3].mxu0 }
 0x123   : > { %v453_v32 = vld [vmem:[#allocation2] sm:$0xff] }
 0x124   : > { %v454_v33 = vadd.f32 %v453_v32, %v452_v31 }
 0x126   : > { %v455_v35 = vpack.c.bf16 %v454_v33, %v454_v33 }
 0x128   : > { %913 = vmatmul.mubr.bf16.vlgmr.msra.gmra.mrb[0].mxu0 %v455_v35 }
 0x1fb   : > { %v561_v44 = vpop.f32.mrb[0].mxu0 }
 0x1fc   : > { %v562_v45 = vadd.f32 %v827_v43, %v561_v44  ;;  %v914_v46 = vpop.f32.mrb[1].mxu0 }
 0x1fd   : > { %v564_v47 = vpop.f32.mrb[2].mxu0 }
 0x1fe   : > { %v568_v48 = vmul.f32 0.044715, %v562_v45  ;;  %v915_v49 = vpop.f32.mrb[3].mxu0  ;;  %v567_v55 = vmul.f32 0.5, %v562_v45 }
 0x200   : > { %v569_v50 = vmul.f32 %v568_v48, %v562_v45 }
 0x202   : > { %v570_v51 = vmul.f32 %v569_v50, %v562_v45 }
 0x204   : > { %v571_v52 = vadd.f32 %v570_v51, %v562_v45 }
 0x206   : > { %v572_v53 = vmul.f32 0.7978846, %v571_v52 }
 0x208   : > { %1037 = vtanh.f32 %v572_v53 }
 0x212   : > { %v1038_v54 = vpop.eup %1037 }
 0x213   : > { %v574_v56 = vadd.f32 1.0, %v1038_v54 }
 0x215   : > { %v575_v57 = vmul.f32 %v574_v56, %v567_v55 }
 0x217   : > { %v576_v58 = vpack.c.bf16 %v575_v57, %v575_v57 }
 0x219   : > { %933 = vmatmul.mubr.bf16.vlgmr.msra.gmra.mrb[0].mxu1 %v576_v58 }
 0x2ec   : > { %v682_v60 = vpop.f32.mrb[0].mxu1 }
 0x2ed   : > { %v683_v61 = vadd.f32 %v836_v59, %v682_v60  ;;  %v934_v62 = vpop.f32.mrb[1].mxu1 }
 0x2ee   : > { %v685_v63 = vpop.f32.mrb[2].mxu1 }
 0x2ef   : > { %v689_v0 = vmul.f32 0.044715, %v683_v61  ;;  %v935_v1 = vpop.f32.mrb[3].mxu1  ;;  %v688_v7 = vmul.f32 0.5, %v683_v61 }
 0x2f1   : > { %v690_v2 = vmul.f32 %v689_v0, %v683_v61 }
 0x2f3   : > { %v691_v3 = vmul.f32 %v690_v2, %v683_v61 }
 0x2f5   : > { %v692_v4 = vadd.f32 %v691_v3, %v683_v61 }
 0x2f7   : > { %v693_v5 = vmul.f32 0.7978846, %v692_v4 }
 0x2f9   : > { %1039 = vtanh.f32 %v693_v5 }
 0x303   : > { %v1040_v6 = vpop.eup %1039 }
 0x304   : > { %v695_v8 = vadd.f32 1.0, %v1040_v6 }
 0x306   : > { %v696_v9 = vmul.f32 %v695_v8, %v688_v7 }
 0x308   : > { %v697_v10 = vadd.f32 %v696_v9, %v454_v33 }
 0x30a   : > { %698 = vst [vmem:[%s308_s26] sm:$0xff] %v697_v10 }
 0x30b PF: > { %s846_s11 = sshll.u32 %s1123_s28, 7  ;;  %s713_s16 = sshll.u32 %s308_s26, 4  ;;  %s714_s16 = int_to_ptr.vmem [resolvable:$true] %s713_s16 }
 0x30c   : > { %s1357_s15 = scalar_lea.hbm %s1415_s7, %s846_s11  ;;  %s1429_s29 = sand.u32 1, %s1111_s25  }
 0x30d   : > { %s700_s30 = scalar_lea.sflag [#allocation4], %s1429_s29  ;;  %s1041_s12 = scalar_lea.vmem %s714_s16, 128 }
 0x30e   : > { %p1042_p4 = scmp.ne.s32.totalorder %s714_s16, %s1041_s12  ;;  %s1143_s18 = smov [#allocation3]  }
 0x30f   : > { %s1045_s20 = sshll.u32 %s1143_s18, 4  ;;  %s1046_s20 = int_to_ptr.vmem [resolvable:$false] %s1045_s20 }
 0x310   : > { %p1043_p5 = pnand %p1042_p4, %p1233_p3  ;;  %s1047_s17 = scalar_lea.vmem %s1046_s20, 256 }
 0x311   : > { %p1048_p7 = scmp.lt.s32.totalorder %s714_s16, %s1046_s20  ;;  %p1049_p8 = scmp.lt.s32.totalorder %s1047_s17, %s1041_s12 }
 0x312   : > { %p1044_p6 = pneg %p1043_p5 }
 0x313   : > { %p1050_p10 = por %p1049_p8, %p1048_p7 }
 0x315   : > { %p1051_p11 = pnand %p1050_p10, %p1044_p6 }
 0x317   : > { %1054 = shalt.err (!%p1051_p11)
}
 0x318   : > { %s1055_s26 = scalar_lea.hbm %s1357_s15, 128  ;;  %s1059_s21 = scalar_lea.hbm %s1415_s7, 256 }
 0x319   : > { %p1056_p12 = scmp.ne.s32.totalorder %s1357_s15, %s1055_s26  ;;  %p1060_p1 = scmp.lt.u32.totalorder %s1357_s15, %s1415_s7 }
 0x31a   : > { %p1061_p2 = scmp.lt.u32.totalorder %s1059_s21, %s1055_s26  ;;  %p1063_p5 = scmp.lt.u32.totalorder %s1055_s26, %s1357_s15 }
 0x31b   : > { %p1057_p13 = pnand %p1056_p12, %p1233_p3 }
 0x31c   : > { %p1062_p4 = por %p1061_p2, %p1060_p1 }
 0x31d   : > { %p1058_p0 = pneg %p1057_p13 }
 0x31e   : > { %p1064_p6 = por %p1063_p5, %p1062_p4 }
 0x320   : > { %p1065_p7 = pnand %p1064_p6, %p1058_p0 }
 0x322   : > { %1068 = shalt.err (!%p1065_p7)
}
 0x323   : > { %936 = dma.vmem_to_hbm [thread:$0]  (%p1233_p3), %s714_s16, 128, %s1357_s15, %s700_s30  }
 0x324 PF: > { %p942_p8 = scmp.ge.s32.totalorder %s1135_s8, 2  ;;  %s725_s23 = sand.u32 1, %s1107_s24  }
 0x325   : > { %s726_s11 = scalar_lea.sflag [#allocation4], %s725_s23 }
 0x326   : > { %p939_p10 = pnand %p942_p8, %p1243_p9 }
 0x328   : > { %1102 = dma.done.wait (!%p939_p10), %s726_s11, 128  }
 0x329   : > { %1104 = vsyncadd (!%p939_p10), %s726_s11, 4294967168  ;;  %s20_s8 = sadd.s32 1, %s1135_s8   ;;  %s1430_s9 = sld [smem:[#allocation6_spill]] }
 0x32a   : > { %p17_p11 = scmp.ge.s32.totalorder %s20_s8, 6   ;;  %s1431_s26 = sld [smem:[#allocation11_spill]] }
 0x32b   : > { %s1432_s27 = sld [smem:[#allocation7_spill]]  ;;  %s1433_s28 = sld [smem:[#allocation8_spill]] }
 0x32c   : > { %s1434_s29 = sld [smem:[#allocation9_spill]]  ;;  %s1435_s30 = sld [smem:[#allocation10_spill]] }
 0x32d   : > { %s1436_s24 = smov %s1111_s25  ;;  %19 = sbr.rel (!%p17_p11) target bundleno = 5 (0x5), region = 97 }
 0x32f   : > { %s1437_s25 = smov %s1430_s9 }
 0x334   :  { %731 = vsyncpa [#allocation4], 1 }
 0x335   :  { %733 = vsyncpa [#allocation4 + $0x1], 1 }

// kernel: convl_forward.4
= control target key start
LH: loop header
LB: loop body
LE: loop exit
PB: predicated region body
PF: predicated region fallthrough
CT: control target
= control target key end

     0   :  { %s1881_s0 = inlined_call_operand.vmem [shape: s32[256], index: 0, kind: input, shape index: {}]   ;;  %s1882_s1 = inlined_call_operand.vmem [shape: bf16[256,128], index: 1, kind: input, shape index: {}]   ;;  %s1883_s2 = inlined_call_operand.vmem [shape: f32[16,128], index: 2, kind: input, shape index: {}]   ;;  %s1884_s3 = inlined_call_operand.vmem [shape: bf16[128,128], index: 3, kind: input, shape index: {}]   ;;  %s1885_s4 = inlined_call_operand.vmem [shape: f32[1,128], index: 4, kind: input, shape index: {}]   ;;  %s1886_s5 = inlined_call_operand.vmem [shape: bf16[128,128], index: 5, kind: input, shape index: {}]   ;;  %s1887_s6 = inlined_call_operand.vmem [shape: f32[1,128], index: 6, kind: input, shape index: {}]   ;;  %s1888_s7 = inlined_call_operand.vmem [shape: bf16[256,128], index: 7, kind: output, shape index: {}]  }
   0x1   :  { %s12_s26 = sshll.u32 %s1881_s0, 4  ;;  %s13_s26 = int_to_ptr.vmem [resolvable:$true] %s12_s26 }
   0x2   :  { %s1465_s27 = scalar_lea.vmem %s13_s26, 32  ;;  %p1470_p1 = scmp.lt.s32.totalorder %s13_s26, %s13_s26 }
   0x3   :  { %p1466_p0 = scmp.ne.s32.totalorder %s13_s26, %s1465_s27  ;;  %p1471_p2 = scmp.lt.s32.totalorder %s1465_s27, %s1465_s27 }
   0x5   :  { %p1472_p3 = por %p1471_p2, %p1470_p1 }
   0x7   :  { %p1473_p4 = pnand %p1472_p3, %p1466_p0 }
   0x9   :  { %1476 = shalt.err (!%p1473_p4)  }
   0xa   :  { %s1495_s28 = smov [#allocation4]  }
   0xb   :  { %15 = dma.vmem_to_smem %s13_s26, 32, %s1495_s28, [#allocation3] }
   0xc   :  { %1485 = dma.done.wait [#allocation3], 32 }
   0xd   :  { %1486 = vsyncadd [#allocation3], 4294967264 }
   0xe   :  { %17 = sfence }
   0xf   :  { %s1539_s29 = smov 0  }
  0x10 LB: > { %s1147_s0 = sadd.s32 4294967295, %s1489_s29   ;;  %p1151_p5 = scmp.ge.s32.totalorder %s1489_s29, 1  ;;  %s1489_s29 = sphi %s1539_s29, %s23_s29  }
  0x11   : > { %p220_p6 = scmp.lt.s32.totalorder %s1489_s29, 3 }
  0x13   : > { %p221_p7 = pnand %p1151_p5, %p220_p6 }
  0x14   : > { %v1377_v0 = vld [vmem:[%s1884_s3] sm:$0xff] (!%p221_p7)   ;;  %s1152_s9 = sshll.u32 (!%p221_p7), %s1147_s0, 4  ;;  %v1378_v1 = vld [vmem:[%s1884_s3 + $0x8] sm:$0xff] (!%p221_p7)   ;;  %v1379_v2 = vld [vmem:[%s1884_s3 + $0x10] sm:$0xff] (!%p221_p7)   ;;  %s1491_s8 = smov (!%p221_p7), 0  }
  0x15   : > { %224 = sbr.rel (%p221_p7) target bundleno = 598 (0x256), region = 44  ;;  %p251_p8 = scmp.lt.s32.totalorder (!%p221_p7), %s1152_s9, 31  ;;  %1296 = vmatprep.subr.bf16.mxu0 (!%p221_p7), %v1377_v0  ;;  %v1380_v3 = vld [vmem:[%s1884_s3 + $0x18] sm:$0xff] (!%p221_p7)   ;;  %v1381_v5 = vld [vmem:[%s1884_s3 + $0x20] sm:$0xff] (!%p221_p7)   ;;  %v1382_v6 = vld [vmem:[%s1884_s3 + $0x28] sm:$0xff] (!%p221_p7)  }
  0x16   : > { %1297 = vmatpush3.bf16.msra.mxu0 (!%p221_p7), %v1377_v0  ;;  %v1383_v7 = vld [vmem:[%s1884_s3 + $0x30] sm:$0xff] (!%p221_p7)   ;;  %v1384_v8 = vld [vmem:[%s1884_s3 + $0x38] sm:$0xff] (!%p221_p7)   ;;  %v1393_v16 = vld [vmem:[%s1886_s5] sm:$0xff] (!%p221_p7)  }
  0x17   : > { %1298 = vmatprep.subr.bf16.mxu0 (!%p221_p7), %v1378_v1  ;;  %1328 = vmatprep.subr.bf16.mxu1 (!%p221_p7), %v1393_v16  ;;  %v1394_v17 = vld [vmem:[%s1886_s5 + $0x8] sm:$0xff] (!%p221_p7)   ;;  %v1395_v18 = vld [vmem:[%s1886_s5 + $0x10] sm:$0xff] (!%p221_p7)   ;;  %v1396_v19 = vld [vmem:[%s1886_s5 + $0x18] sm:$0xff] (!%p221_p7)  }
  0x18   : > { %1329 = vmatpush3.bf16.msra.mxu1 (!%p221_p7), %v1393_v16  ;;  %v1397_v20 = vld [vmem:[%s1886_s5 + $0x20] sm:$0xff] (!%p221_p7)   ;;  %v1398_v21 = vld [vmem:[%s1886_s5 + $0x28] sm:$0xff] (!%p221_p7)   ;;  %v1399_v22 = vld [vmem:[%s1886_s5 + $0x30] sm:$0xff] (!%p221_p7)  }
  0x19   : > { %1330 = vmatprep.subr.bf16.mxu1 (!%p221_p7), %v1394_v17  ;;  %v1400_v23 = vld [vmem:[%s1886_s5 + $0x38] sm:$0xff] (!%p221_p7)   ;;  %v1618_v24 = vld [vmem:[%s1885_s4] ss:$0 sm:$0xff] (!%p221_p7) }
  0x1a   : > { %1299 = vmatpush3.bf16.msra.mxu0 (!%p221_p7), %v1378_v1 }
  0x1b   : > { %1300 = vmatprep.subr.bf16.mxu0 (!%p221_p7), %v1379_v2 }
  0x1c   : > { %s1890_s9 = smov (!%p251_p8, %s1152_s9), 31  ;;  %1331 = vmatpush3.bf16.msra.mxu1 %v1394_v17 }
  0x1d   : > { %s1153_s14 = sshll.u32 %s1890_s9, 2  ;;  %1332 = vmatprep.subr.bf16.mxu1 %v1395_v18 }
  0x1e   : > { %s1561_s17 = scalar_lea.vmem %s1882_s1, %s1153_s14  ;;  %s1566_s20 = scalar_lea.vmem %s1888_s7, %s1153_s14  ;;  %1301 = vmatpush3.bf16.msra.mxu0 %v1379_v2 }
  0x1f   : > { %v1385_v4 = vld [vmem:[%s1561_s17] sm:$0xff]   ;;  %1302 = vmatprep.subr.bf16.mxu0 %v1380_v3  ;;  %v1386_v9 = vld [vmem:[%s1561_s17 + $0x8] sm:$0xff]   ;;  %v1387_v10 = vld [vmem:[%s1561_s17 + $0x10] sm:$0xff]  }
  0x20   : > { %1312 = vmatprep.mubr.bf16.mxu0 %v1385_v4  ;;  %v1388_v11 = vld [vmem:[%s1561_s17 + $0x18] sm:$0xff]   ;;  %v1389_v12 = vld [vmem:[%s1561_s17 + $0x20] sm:$0xff]   ;;  %v1390_v13 = vld [vmem:[%s1561_s17 + $0x28] sm:$0xff]   ;;  %1333 = vmatpush3.bf16.msra.mxu1 %v1395_v18 }
  0x21   : > { %v1391_v14 = vld [vmem:[%s1561_s17 + $0x30] sm:$0xff]   ;;  %v1392_v15 = vld [vmem:[%s1561_s17 + $0x38] sm:$0xff]   ;;  %1334 = vmatprep.subr.bf16.mxu1 %v1396_v19 }
  0x22   : > { %1303 = vmatpush3.bf16.msra.mxu0 %v1380_v3 }
  0x23   : > { %1304 = vmatprep.subr.bf16.mxu0 %v1381_v5 }
  0x24   : > { %1335 = vmatpush3.bf16.msra.mxu1 %v1396_v19 }
  0x25   : > { %1336 = vmatprep.subr.bf16.mxu1 %v1397_v20 }
  0x26   : > { %1305 = vmatpush3.bf16.msra.mxu0 %v1381_v5 }
  0x27   : > { %1306 = vmatprep.subr.bf16.mxu0 %v1382_v6 }
  0x28   : > { %1337 = vmatpush3.bf16.msra.mxu1 %v1397_v20 }
  0x29   : > { %1338 = vmatprep.subr.bf16.mxu1 %v1398_v21 }
  0x2a   : > { %1307 = vmatpush3.bf16.msra.mxu0 %v1382_v6 }
  0x2b   : > { %1308 = vmatprep.subr.bf16.mxu0 %v1383_v7 }
  0x2c   : > { %1339 = vmatpush3.bf16.msra.mxu1 %v1398_v21 }
  0x2d   : > { %1340 = vmatprep.subr.bf16.mxu1 %v1399_v22 }
  0x2e   : > { %1309 = vmatpush3.bf16.msra.mxu0 %v1383_v7 }
  0x2f   : > { %1310 = vmatprep.subr.bf16.mxu0 %v1384_v8 }
  0x30   : > { %1341 = vmatpush3.bf16.msra.mxu1 %v1399_v22 }
  0x31   : > { %1342 = vmatprep.subr.bf16.mxu1 %v1400_v23 }
  0x32   : > { %1311 = vmatpush3.bf16.msra.mxu0 %v1384_v8 }
  0x34   : > { %1343 = vmatpush3.bf16.msra.mxu1 %v1400_v23 }
  0x35   : > { %1313 = vmatmul.mubr.bf16.vlgmr.msra.gmra.mrb[0].mxu0 %v1386_v9 }
  0x36   : > { %1316 = vmatprep.mubr.bf16.mxu0 %v1387_v10 }
  0x3d   : > { %1317 = vmatmul.mubr.bf16.gmra.mrb[4].mxu0 %v1388_v11 }
  0x3e   : > { %1320 = vmatprep.mubr.bf16.mxu0 %v1389_v12 }
  0x45   : > { %1321 = vmatmul.mubr.bf16.gmra.mrb[8].mxu0 %v1390_v13 }
  0x46   : > { %1324 = vmatprep.mubr.bf16.mxu0 %v1391_v14 }
  0x4d   : > { %1325 = vmatmul.mubr.bf16.gmra.mrb[12].mxu0 %v1392_v15 }
 0x108   : > { %v1314_v25 = vpop.f32.mrb[0].mxu0 }
 0x109   : > { %v441_v26 = vadd.f32 %v1314_v25, %v1618_v24  ;;  %v432_v27 = vpop.f32.mrb[1].mxu0 }
 0x10a   : > { %v433_v28 = vadd.f32 %v1618_v24, %v432_v27  ;;  %v1315_v29 = vpop.f32.mrb[2].mxu0 }
 0x10b   : > { %v513_v30 = vmul.f32 0.044715, %v441_v26  ;;  %v1623_v31 = vadd.f32 %v1315_v29, %v1618_v24  ;;  %v435_v32 = vpop.f32.mrb[3].mxu0  ;;  %v497_v11 = vmul.f32 0.5, %v441_v26 }
 0x10c   : > { %v511_v33 = vmul.f32 0.044715, %v433_v28  ;;  %v1626_v34 = vadd.f32 %v1618_v24, %v435_v32  ;;  %v495_v20 = vmul.f32 0.5, %v433_v28 }
 0x10d   : > { %v529_v35 = vmul.f32 %v513_v30, %v441_v26  ;;  %v514_v36 = vmul.f32 0.044715, %v1623_v31 }
 0x10e   : > { %v512_v37 = vmul.f32 0.044715, %v1626_v34  ;;  %v527_v38 = vmul.f32 %v511_v33, %v433_v28 }
 0x10f   : > { %v545_v39 = vmul.f32 %v529_v35, %v441_v26  ;;  %v530_v40 = vmul.f32 %v514_v36, %v1623_v31 }
 0x110   : > { %v1318_v41 = vpop.f32.mrb[4].mxu0  ;;  %v528_v42 = vmul.f32 %v512_v37, %v1626_v34  ;;  %v543_v43 = vmul.f32 %v527_v38, %v433_v28  ;;  %v496_v38 = vmul.f32 0.5, %v1626_v34 }
 0x111   : > { %v546_v44 = vmul.f32 %v530_v40, %v1623_v31  ;;  %v1634_v45 = vadd.f32 %v1318_v41, %v1618_v24  ;;  %v448_v46 = vpop.f32.mrb[5].mxu0  ;;  %v561_v47 = vadd.f32 %v545_v39, %v441_v26  ;;  %v498_v39 = vmul.f32 0.5, %v1623_v31 }
 0x112   : > { %v449_v48 = vadd.f32 %v1618_v24, %v448_v46  ;;  %v1319_v49 = vpop.f32.mrb[6].mxu0  ;;  %v544_v50 = vmul.f32 %v528_v42, %v1626_v34  ;;  %v559_v51 = vadd.f32 %v543_v43, %v433_v28 }
 0x113   : > { %v517_v52 = vmul.f32 0.044715, %v1634_v45  ;;  %v1640_v53 = vadd.f32 %v1319_v49, %v1618_v24  ;;  %v451_v54 = vpop.f32.mrb[7].mxu0  ;;  %v562_v55 = vadd.f32 %v546_v44, %v1623_v31  ;;  %v577_v56 = vmul.f32 0.7978846, %v561_v47 }
 0x114   : > { %v515_v57 = vmul.f32 0.044715, %v449_v48  ;;  %v1644_v58 = vadd.f32 %v1618_v24, %v451_v54  ;;  %v560_v59 = vadd.f32 %v544_v50, %v1626_v34  ;;  %v575_v60 = vmul.f32 0.7978846, %v559_v51 }
 0x115   : > { %v533_v61 = vmul.f32 %v517_v52, %v1634_v45  ;;  %v518_v62 = vmul.f32 0.044715, %v1640_v53  ;;  %v578_v63 = vmul.f32 0.7978846, %v562_v55  ;;  %1401 = vtanh.f32 %v577_v56 }
 0x116   : > { %v531_v0 = vmul.f32 %v515_v57, %v449_v48  ;;  %v516_v1 = vmul.f32 0.044715, %v1644_v58  ;;  %v576_v2 = vmul.f32 0.7978846, %v560_v59  ;;  %1403 = vtanh.f32 %v575_v60 }
 0x117   : > { %v549_v3 = vmul.f32 %v533_v61, %v1634_v45  ;;  %v534_v4 = vmul.f32 %v518_v62, %v1640_v53  ;;  %1405 = vtanh.f32 %v578_v63  ;;  %v499_v44 = vmul.f32 0.5, %v449_v48 }
 0x118   : > { %v547_v5 = vmul.f32 %v531_v0, %v449_v48  ;;  %v532_v6 = vmul.f32 %v516_v1, %v1644_v58  ;;  %v1322_v7 = vpop.f32.mrb[8].mxu0  ;;  %1407 = vtanh.f32 %v576_v2 }
 0x119   : > { %v550_v8 = vmul.f32 %v534_v4, %v1640_v53  ;;  %v1655_v9 = vadd.f32 %v1322_v7, %v1618_v24  ;;  %v464_v10 = vpop.f32.mrb[9].mxu0  ;;  %v565_v16 = vadd.f32 %v549_v3, %v1634_v45 }
 0x11a   : > { %v548_v12 = vmul.f32 %v532_v6, %v1644_v58  ;;  %v1659_v13 = vadd.f32 %v1618_v24, %v464_v10  ;;  %v1323_v14 = vpop.f32.mrb[10].mxu0  ;;  %v563_v15 = vadd.f32 %v547_v5, %v449_v48 }
 0x11b   : > { %v521_v17 = vmul.f32 0.044715, %v1655_v9  ;;  %v1664_v18 = vadd.f32 %v1323_v14, %v1618_v24  ;;  %v467_v19 = vpop.f32.mrb[11].mxu0  ;;  %v566_v21 = vadd.f32 %v550_v8, %v1640_v53  ;;  %v581_v30 = vmul.f32 0.7978846, %v565_v16 }
 0x11c   : > { %v519_v22 = vmul.f32 0.044715, %v1659_v13  ;;  %v1669_v23 = vadd.f32 %v1618_v24, %v467_v19  ;;  %v564_v25 = vadd.f32 %v548_v12, %v1644_v58  ;;  %v579_v26 = vmul.f32 0.7978846, %v563_v15 }
 0x11d   : > { %v537_v27 = vmul.f32 %v521_v17, %v1655_v9  ;;  %v522_v29 = vmul.f32 0.044715, %v1664_v18  ;;  %v582_v32 = vmul.f32 0.7978846, %v566_v21  ;;  %v501_v19 = vmul.f32 0.5, %v1634_v45 }
 0x11e   : > { %v535_v33 = vmul.f32 %v519_v22, %v1659_v13  ;;  %v520_v28 = vmul.f32 0.044715, %v1669_v23  ;;  %v580_v35 = vmul.f32 0.7978846, %v564_v25  ;;  %1409 = vtanh.f32 %v579_v26 }
 0x11f   : > { %v1402_v36 = vpop.eup %1401  ;;  %v538_v37 = vmul.f32 %v522_v29, %v1664_v18  ;;  %1411 = vtanh.f32 %v581_v30  ;;  %v553_v31 = vmul.f32 %v537_v27, %v1655_v9 }
 0x120   : > { %v1404_v40 = vpop.eup %1403  ;;  %v536_v41 = vmul.f32 %v520_v28, %v1669_v23  ;;  %v1326_v42 = vpop.f32.mrb[12].mxu0  ;;  %v609_v43 = vadd.f32 1.0, %v1402_v36  ;;  %1413 = vtanh.f32 %v580_v35  ;;  %v551_v47 = vmul.f32 %v535_v33, %v1659_v13 }
 0x121   : > { %v1406_v46 = vpop.eup %1405  ;;  %v1682_v49 = vadd.f32 %v1326_v42, %v1618_v24  ;;  %v480_v50 = vpop.f32.mrb[13].mxu0  ;;  %v607_v51 = vadd.f32 1.0, %v1404_v40  ;;  %1415 = vtanh.f32 %v582_v32  ;;  %v554_v56 = vmul.f32 %v538_v37, %v1664_v18 }
 0x122   : > { %v1408_v34 = vpop.eup %1407  ;;  %v552_v52 = vmul.f32 %v536_v41, %v1669_v23  ;;  %v1687_v54 = vadd.f32 %v1618_v24, %v480_v50  ;;  %v1327_v55 = vpop.f32.mrb[14].mxu0  ;;  %v610_v48 = vadd.f32 1.0, %v1406_v46  ;;  %v625_v0 = vmul.f32 %v609_v43, %v497_v11 }
 0x123   : > { %v525_v57 = vmul.f32 0.044715, %v1682_v49  ;;  %v1692_v59 = vadd.f32 %v1327_v55, %v1618_v24  ;;  %v483_v60 = vpop.f32.mrb[15].mxu0  ;;  %v608_v61 = vadd.f32 1.0, %v1408_v34  ;;  %v623_v3 = vmul.f32 %v607_v51, %v495_v20 }
 0x124   : > { %v523_v62 = vmul.f32 0.044715, %v1687_v54  ;;  %v1696_v63 = vadd.f32 %v1618_v24, %v483_v60  ;;  %v626_v1 = vmul.f32 %v610_v48, %v498_v39  ;;  %v567_v5 = vadd.f32 %v551_v47, %v1659_v13 }
 0x125   : > { %v526_v2 = vmul.f32 0.044715, %v1692_v59  ;;  %v624_v4 = vmul.f32 %v608_v61, %v496_v38  ;;  %v568_v10 = vadd.f32 %v552_v52, %v1669_v23  ;;  %v541_v12 = vmul.f32 %v525_v57, %v1682_v49 }
 0x126   : > { %v539_v6 = vmul.f32 %v523_v62, %v1687_v54  ;;  %v524_v7 = vmul.f32 0.044715, %v1696_v63  ;;  %v640_v8 = vpack.c.bf16 %v626_v1, %v625_v0  ;;  %v500_v24 = vmul.f32 0.5, %v1644_v58 }
 0x127   : > { %v639_v14 = vpack.c.bf16 %v624_v4, %v623_v3  ;;  %v583_v11 = vmul.f32 0.7978846, %v567_v5  ;;  %v542_v16 = vmul.f32 %v526_v2, %v1692_v59  ;;  %v584_v20 = vmul.f32 0.7978846, %v568_v10 }
 0x128   : > { %v1410_v15 = vpop.eup %1409  ;;  %v540_v17 = vmul.f32 %v524_v7, %v1696_v63  ;;  %v555_v22 = vmul.f32 %v539_v6, %v1687_v54  ;;  %v569_v26 = vadd.f32 %v553_v31, %v1655_v9  ;;  %v570_v30 = vadd.f32 %v554_v56, %v1664_v18 }
 0x129   : > { %v1412_v21 = vpop.eup %1411  ;;  %1344 = vmatprep.mubr.bf16.mxu1 %v639_v14  ;;  %v611_v25 = vadd.f32 1.0, %v1410_v15  ;;  %1417 = vtanh.f32 %v583_v11  ;;  %v557_v45 = vmul.f32 %v541_v12, %v1682_v49  ;;  %v502_v28 = vmul.f32 0.5, %v1640_v53 }
 0x12a   : > { %v1414_v27 = vpop.eup %1413  ;;  %v556_v58 = vmul.f32 %v540_v17, %v1696_v63  ;;  %1345 = vmatmul.mubr.bf16.vlgmr.msra.gmra.mrb[0].mxu1 %v640_v8  ;;  %v613_v29 = vadd.f32 1.0, %v1412_v21  ;;  %1419 = vtanh.f32 %v584_v20  ;;  %v585_v35 = vmul.f32 0.7978846, %v569_v26 }
 0x12b   : > { %v1416_v32 = vpop.eup %1415  ;;  %v612_v33 = vadd.f32 1.0, %v1414_v27  ;;  %v558_v36 = vmul.f32 %v542_v16, %v1692_v59  ;;  %v627_v37 = vmul.f32 %v611_v25, %v499_v44  ;;  %v586_v39 = vmul.f32 0.7978846, %v570_v30 }
 0x12c   : > { %v614_v38 = vadd.f32 1.0, %v1416_v32  ;;  %1421 = vtanh.f32 %v585_v35  ;;  %v571_v41 = vadd.f32 %v555_v22, %v1687_v54  ;;  %v572_v42 = vadd.f32 %v556_v58, %v1696_v63 }
 0x12d   : > { %v628_v40 = vmul.f32 %v612_v33, %v500_v24  ;;  %v629_v43 = vmul.f32 %v613_v29, %v501_v19  ;;  %1423 = vtanh.f32 %v586_v39  ;;  %v573_v53 = vadd.f32 %v557_v45, %v1682_v49 }
 0x12e   : > { %v630_v46 = vmul.f32 %v614_v38, %v502_v28  ;;  %v587_v50 = vmul.f32 0.7978846, %v571_v41  ;;  %v588_v51 = vmul.f32 0.7978846, %v572_v42  ;;  %v574_v31 = vadd.f32 %v558_v36, %v1692_v59 }
 0x12f   : > { %v641_v47 = vpack.c.bf16 %v628_v40, %v627_v37  ;;  %v589_v44 = vmul.f32 0.7978846, %v573_v53  ;;  %v503_v57 = vmul.f32 0.5, %v1659_v13  ;;  %v504_v60 = vmul.f32 0.5, %v1669_v23 }
 0x130   : > { %v642_v34 = vpack.c.bf16 %v630_v46, %v629_v43  ;;  %1425 = vtanh.f32 %v587_v50  ;;  %v590_v52 = vmul.f32 0.7978846, %v574_v31  ;;  %v505_v5 = vmul.f32 0.5, %v1655_v9 }
 0x131   : > { %1348 = vmatprep.mubr.bf16.mxu1 %v641_v47  ;;  %1427 = vtanh.f32 %v588_v51  ;;  %v506_v6 = vmul.f32 0.5, %v1664_v18  ;;  %v507_v11 = vmul.f32 0.5, %v1687_v54  ;;  %v508_v15 = vmul.f32 0.5, %v1696_v63  ;;  %v1730_v54 = vld [vmem:[%s1887_s6] ss:$0 sm:$0xff] }
 0x132   : > { %1349 = vmatmul.mubr.bf16.gmra.mrb[4].mxu1 %v642_v34  ;;  %1429 = vtanh.f32 %v589_v44  ;;  %v509_v19 = vmul.f32 0.5, %v1682_v49  ;;  %v510_v21 = vmul.f32 0.5, %v1692_v59 }
 0x133   : > { %v1418_v55 = vpop.eup %1417  ;;  %1431 = vtanh.f32 %v590_v52 }
 0x134   : > { %v1420_v48 = vpop.eup %1419  ;;  %v615_v56 = vadd.f32 1.0, %v1418_v55 }
 0x135   : > { %v616_v61 = vadd.f32 1.0, %v1420_v48 }
 0x136   : > { %v1422_v62 = vpop.eup %1421  ;;  %v631_v0 = vmul.f32 %v615_v56, %v503_v57 }
 0x137   : > { %v632_v1 = vmul.f32 %v616_v61, %v504_v60  ;;  %v1424_v2 = vpop.eup %1423  ;;  %v617_v3 = vadd.f32 1.0, %v1422_v62 }
 0x138   : > { %v618_v7 = vadd.f32 1.0, %v1424_v2 }
 0x139   : > { %v643_v4 = vpack.c.bf16 %v632_v1, %v631_v0  ;;  %v633_v10 = vmul.f32 %v617_v3, %v505_v5 }
 0x13a   : > { %v1426_v8 = vpop.eup %1425  ;;  %v634_v12 = vmul.f32 %v618_v7, %v506_v6 }
 0x13b   : > { %1352 = vmatprep.mubr.bf16.mxu1 %v643_v4  ;;  %v1428_v14 = vpop.eup %1427  ;;  %v619_v13 = vadd.f32 1.0, %v1426_v8 }
 0x13c   : > { %v1430_v24 = vpop.eup %1429  ;;  %v644_v23 = vpack.c.bf16 %v634_v12, %v633_v10  ;;  %v620_v16 = vadd.f32 1.0, %v1428_v14 }
 0x13d   : > { %v1432_v17 = vpop.eup %1431  ;;  %v621_v9 = vadd.f32 1.0, %v1430_v24  ;;  %v635_v18 = vmul.f32 %v619_v13, %v507_v11 }
 0x13e   : > { %1353 = vmatmul.mubr.bf16.gmra.mrb[8].mxu1 %v644_v23  ;;  %v636_v20 = vmul.f32 %v620_v16, %v508_v15  ;;  %v622_v22 = vadd.f32 1.0, %v1432_v17 }
 0x13f   : > { %v637_v26 = vmul.f32 %v621_v9, %v509_v19 }
 0x140   : > { %v645_v25 = vpack.c.bf16 %v636_v20, %v635_v18  ;;  %v638_v27 = vmul.f32 %v622_v22, %v510_v21 }
 0x142   : > { %1356 = vmatprep.mubr.bf16.mxu1 %v645_v25  ;;  %v646_v58 = vpack.c.bf16 %v638_v27, %v637_v26 }
 0x146   : > { %1357 = vmatmul.mubr.bf16.gmra.mrb[12].mxu1 %v646_v58 }
 0x1fd   : > { %v1346_v63 = vpop.f32.mrb[0].mxu1 }
 0x1fe   : > { %v761_v49 = vadd.f32 %v1346_v63, %v1730_v54  ;;  %v752_v29 = vpop.f32.mrb[1].mxu1 }
 0x1ff   : > { %v753_v30 = vadd.f32 %v1730_v54, %v752_v29  ;;  %v1347_v32 = vpop.f32.mrb[2].mxu1 }
 0x200   : > { %v833_v59 = vmul.f32 0.044715, %v761_v49  ;;  %v1735_v45 = vadd.f32 %v1347_v32, %v1730_v54  ;;  %v755_v33 = vpop.f32.mrb[3].mxu1  ;;  %v817_v22 = vmul.f32 0.5, %v761_v49 }
 0x201   : > { %v831_v28 = vmul.f32 0.044715, %v753_v30  ;;  %v1738_v35 = vadd.f32 %v1730_v54, %v755_v33  ;;  %v815_v25 = vmul.f32 0.5, %v753_v30 }
 0x202   : > { %v849_v36 = vmul.f32 %v833_v59, %v761_v49  ;;  %v834_v37 = vmul.f32 0.044715, %v1735_v45  ;;  %v818_v32 = vmul.f32 0.5, %v1735_v45 }
 0x203   : > { %v847_v38 = vmul.f32 %v831_v28, %v753_v30  ;;  %v832_v39 = vmul.f32 0.044715, %v1738_v35 }
 0x204   : > { %v865_v40 = vmul.f32 %v849_v36, %v761_v49  ;;  %v850_v41 = vmul.f32 %v834_v37, %v1735_v45  ;;  %v816_v37 = vmul.f32 0.5, %v1738_v35 }
 0x205   : > { %v863_v42 = vmul.f32 %v847_v38, %v753_v30  ;;  %v848_v43 = vmul.f32 %v832_v39, %v1738_v35  ;;  %v1350_v46 = vpop.f32.mrb[4].mxu1 }
 0x206   : > { %v881_v47 = vadd.f32 %v865_v40, %v761_v49  ;;  %v866_v50 = vmul.f32 %v850_v41, %v1735_v45  ;;  %v1746_v51 = vadd.f32 %v1350_v46, %v1730_v54  ;;  %v768_v53 = vpop.f32.mrb[5].mxu1 }
 0x207   : > { %v879_v34 = vadd.f32 %v863_v42, %v753_v30  ;;  %v864_v31 = vmul.f32 %v848_v43, %v1738_v35  ;;  %v1750_v44 = vadd.f32 %v1730_v54, %v768_v53  ;;  %v1351_v52 = vpop.f32.mrb[6].mxu1 }
 0x208   : > { %v897_v55 = vmul.f32 0.7978846, %v881_v47  ;;  %v882_v48 = vadd.f32 %v866_v50, %v1735_v45  ;;  %v837_v56 = vmul.f32 0.044715, %v1746_v51  ;;  %v771_v57 = vpop.f32.mrb[7].mxu1  ;;  %v1758_v2 = vadd.f32 %v1351_v52, %v1730_v54 }
 0x209   : > { %v895_v60 = vmul.f32 0.7978846, %v879_v34  ;;  %v880_v61 = vadd.f32 %v864_v31, %v1738_v35  ;;  %v835_v62 = vmul.f32 0.044715, %v1750_v44  ;;  %v1762_v5 = vadd.f32 %v1730_v54, %v771_v57 }
 0x20a   : > { %1433 = vtanh.f32 %v897_v55  ;;  %v898_v0 = vmul.f32 0.7978846, %v882_v48  ;;  %v853_v1 = vmul.f32 %v837_v56, %v1746_v51  ;;  %v838_v7 = vmul.f32 0.044715, %v1758_v2 }
 0x20b   : > { %1435 = vtanh.f32 %v895_v60  ;;  %v896_v3 = vmul.f32 0.7978846, %v880_v61  ;;  %v851_v4 = vmul.f32 %v835_v62, %v1750_v44  ;;  %v836_v10 = vmul.f32 0.044715, %v1762_v5 }
 0x20c   : > { %1437 = vtanh.f32 %v898_v0  ;;  %v869_v6 = vmul.f32 %v853_v1, %v1746_v51  ;;  %v854_v14 = vmul.f32 %v838_v7, %v1758_v2  ;;  %v821_v55 = vmul.f32 0.5, %v1746_v51 }
 0x20d   : > { %1439 = vtanh.f32 %v896_v3  ;;  %v867_v8 = vmul.f32 %v851_v4, %v1750_v44  ;;  %v852_v24 = vmul.f32 %v836_v10, %v1762_v5  ;;  %v819_v62 = vmul.f32 0.5, %v1750_v44 }
 0x20e   : > { %v885_v12 = vadd.f32 %v869_v6, %v1746_v51  ;;  %v870_v11 = vmul.f32 %v854_v14, %v1758_v2  ;;  %v822_v0 = vmul.f32 0.5, %v1758_v2 }
 0x20f   : > { %v883_v13 = vadd.f32 %v867_v8, %v1750_v44  ;;  %v868_v16 = vmul.f32 %v852_v24, %v1762_v5 }
 0x210   : > { %v901_v23 = vmul.f32 0.7978846, %v885_v12  ;;  %v886_v17 = vadd.f32 %v870_v11, %v1758_v2 }
 0x211   : > { %v899_v15 = vmul.f32 0.7978846, %v883_v13  ;;  %v1354_v19 = vpop.f32.mrb[8].mxu1  ;;  %v884_v9 = vadd.f32 %v868_v16, %v1762_v5 }
 0x212   : > { %1441 = vtanh.f32 %v901_v23  ;;  %v1777_v18 = vadd.f32 %v1354_v19, %v1730_v54  ;;  %v784_v20 = vpop.f32.mrb[9].mxu1  ;;  %v902_v26 = vmul.f32 0.7978846, %v886_v17  ;;  %v820_v23 = vmul.f32 0.5, %v1762_v5 }
 0x213   : > { %1443 = vtanh.f32 %v899_v15  ;;  %v1780_v27 = vadd.f32 %v1730_v54, %v784_v20  ;;  %v1355_v58 = vpop.f32.mrb[10].mxu1  ;;  %v900_v59 = vmul.f32 0.7978846, %v884_v9 }
 0x214   : > { %v1434_v21 = vpop.eup %1433  ;;  %v841_v33 = vmul.f32 0.044715, %v1777_v18  ;;  %1445 = vtanh.f32 %v902_v26  ;;  %v787_v30 = vpop.f32.mrb[11].mxu1  ;;  %v1793_v46 = vadd.f32 %v1355_v58, %v1730_v54 }
 0x215   : > { %v1436_v63 = vpop.eup %1435  ;;  %v929_v29 = vadd.f32 1.0, %v1434_v21  ;;  %v839_v49 = vmul.f32 0.044715, %v1780_v27  ;;  %1447 = vtanh.f32 %v900_v59  ;;  %v1799_v50 = vadd.f32 %v1730_v54, %v787_v30 }
 0x216   : > { %v1438_v28 = vpop.eup %1437  ;;  %v927_v36 = vadd.f32 1.0, %v1436_v63  ;;  %v857_v41 = vmul.f32 %v841_v33, %v1777_v18  ;;  %v842_v31 = vmul.f32 0.044715, %v1793_v46 }
 0x217   : > { %v1440_v38 = vpop.eup %1439  ;;  %v1786_v39 = vmul.f32 %v929_v29, %v817_v22  ;;  %v930_v40 = vadd.f32 1.0, %v1438_v28  ;;  %v855_v43 = vmul.f32 %v839_v49, %v1780_v27  ;;  %v840_v56 = vmul.f32 0.044715, %v1799_v50 }
 0x218   : > { %v1789_v42 = vmul.f32 %v927_v36, %v815_v25  ;;  %v928_v45 = vadd.f32 1.0, %v1440_v38  ;;  %v873_v47 = vmul.f32 %v857_v41, %v1777_v18  ;;  %v858_v3 = vmul.f32 %v842_v31, %v1793_v46 }
 0x219   : > { %v1795_v35 = vmul.f32 %v930_v40, %v818_v32  ;;  %v871_v34 = vmul.f32 %v855_v43, %v1780_v27  ;;  %v1358_v52 = vpop.f32.mrb[12].mxu1  ;;  %v856_v8 = vmul.f32 %v840_v56, %v1799_v50  ;;  %v825_v31 = vmul.f32 0.5, %v1777_v18 }
 0x21a   : > { %v1801_v53 = vmul.f32 %v928_v45, %v816_v37  ;;  %v889_v48 = vadd.f32 %v873_v47, %v1777_v18  ;;  %v1809_v57 = vadd.f32 %v1358_v52, %v1730_v54  ;;  %v800_v60 = vpop.f32.mrb[13].mxu1  ;;  %v874_v44 = vmul.f32 %v858_v3, %v1793_v46 }
 0x21b   : > { %v887_v1 = vadd.f32 %v871_v34, %v1780_v27  ;;  %v1359_v4 = vpop.f32.mrb[14].mxu1  ;;  %v1817_v10 = vadd.f32 %v1730_v54, %v800_v60  ;;  %v872_v11 = vmul.f32 %v856_v8, %v1799_v50  ;;  %v824_v18 = vmul.f32 0.5, %v1799_v50 }
 0x21c   : > { %v1442_v61 = vpop.eup %1441  ;;  %v905_v7 = vmul.f32 0.7978846, %v889_v48  ;;  %v803_v12 = vpop.f32.mrb[15].mxu1  ;;  %v845_v2 = vmul.f32 0.044715, %v1809_v57  ;;  %v890_v17 = vadd.f32 %v874_v44, %v1793_v46  ;;  %v812_v25 = vadd.f32 %v1359_v4, %v1730_v54 }
 0x21d   : > { %v1444_v6 = vpop.eup %1443  ;;  %v933_v51 = vadd.f32 1.0, %v1442_v61  ;;  %v903_v13 = vmul.f32 0.7978846, %v887_v1  ;;  %v888_v21 = vadd.f32 %v872_v11, %v1799_v50  ;;  %v843_v22 = vmul.f32 0.044715, %v1817_v10 }
 0x21e   : > { %v931_v14 = vadd.f32 1.0, %v1444_v6  ;;  %1449 = vtanh.f32 %v905_v7  ;;  %v1446_v15 = vpop.eup %1445  ;;  %v861_v19 = vmul.f32 %v845_v2, %v1809_v57  ;;  %v906_v26 = vmul.f32 0.7978846, %v890_v17 }
 0x21f   : > { %v1821_v24 = vmul.f32 %v933_v51, %v821_v55  ;;  %1451 = vtanh.f32 %v903_v13  ;;  %v1448_v9 = vpop.eup %1447  ;;  %v934_v20 = vadd.f32 1.0, %v1446_v15  ;;  %v804_v63 = vadd.f32 %v1730_v54, %v803_v12 }
 0x220   : > { %v1825_v16 = vmul.f32 %v931_v14, %v819_v62  ;;  %v932_v5 = vadd.f32 1.0, %v1448_v9  ;;  %v877_v58 = vmul.f32 %v861_v19, %v1809_v57  ;;  %v904_v32 = vmul.f32 0.7978846, %v888_v21 }
 0x221   : > { %v1834_v29 = vmul.f32 %v934_v20, %v822_v0  ;;  %v859_v59 = vmul.f32 %v843_v22, %v1817_v10  ;;  %1453 = vtanh.f32 %v906_v26  ;;  %v846_v36 = vmul.f32 0.044715, %v812_v25 }
 0x222   : > { %v1837_v33 = vmul.f32 %v932_v5, %v820_v23  ;;  %v893_v28 = vadd.f32 %v877_v58, %v1809_v57  ;;  %1455 = vtanh.f32 %v904_v32  ;;  %v844_v49 = vmul.f32 0.044715, %v804_v63 }
 0x223   : > { %v875_v37 = vmul.f32 %v859_v59, %v1817_v10  ;;  %v862_v38 = vmul.f32 %v846_v36, %v812_v25  ;;  %v823_v48 = vmul.f32 0.5, %v1780_v27  ;;  %v826_v6 = vmul.f32 0.5, %v1793_v46 }
 0x224   : > { %v909_v30 = vmul.f32 0.7978846, %v893_v28  ;;  %v860_v54 = vmul.f32 %v844_v49, %v804_v63  ;;  %v829_v14 = vmul.f32 0.5, %v1809_v57  ;;  %v827_v23 = vmul.f32 0.5, %v1817_v10 }
 0x225   : > { %v891_v40 = vadd.f32 %v875_v37, %v1817_v10  ;;  %v878_v41 = vmul.f32 %v862_v38, %v812_v25  ;;  %v830_v19 = vmul.f32 0.5, %v812_v25  ;;  %v828_v50 = vmul.f32 0.5, %v804_v63 }
 0x226   : > { %1457 = vtanh.f32 %v909_v30  ;;  %v876_v47 = vmul.f32 %v860_v54, %v804_v63 }
 0x227   : > { %v907_v43 = vmul.f32 0.7978846, %v891_v40  ;;  %v894_v55 = vadd.f32 %v878_v41, %v812_v25 }
 0x228   : > { %v1450_v45 = vpop.eup %1449  ;;  %v892_v60 = vadd.f32 %v876_v47, %v804_v63 }
 0x229   : > { %v1452_v34 = vpop.eup %1451  ;;  %v937_v52 = vadd.f32 1.0, %v1450_v45  ;;  %1459 = vtanh.f32 %v907_v43  ;;  %v910_v62 = vmul.f32 0.7978846, %v894_v55 }
 0x22a   : > { %v935_v56 = vadd.f32 1.0, %v1452_v34  ;;  %v908_v1 = vmul.f32 0.7978846, %v892_v60 }
 0x22b   : > { %v1844_v61 = vmul.f32 %v937_v52, %v825_v31  ;;  %v1454_v3 = vpop.eup %1453  ;;  %1461 = vtanh.f32 %v910_v62 }
 0x22c   : > { %v951_v0 = vmul.f32 %v935_v56, %v823_v48  ;;  %v1456_v4 = vpop.eup %1455  ;;  %v938_v51 = vadd.f32 1.0, %v1454_v3  ;;  %1463 = vtanh.f32 %v908_v1 }
 0x22d   : > { %v936_v7 = vadd.f32 1.0, %v1456_v4 }
 0x22e   : > { %v1848_v8 = vmul.f32 %v938_v51, %v826_v6 }
 0x22f   : > { %v952_v12 = vmul.f32 %v936_v7, %v824_v18 }
 0x230   : > { %v1458_v27 = vpop.eup %1457 }
 0x231   : > { %v941_v13 = vadd.f32 1.0, %v1458_v27 }
 0x233   : > { %v1460_v44 = vpop.eup %1459  ;;  %v1851_v2 = vmul.f32 %v941_v13, %v829_v14 }
 0x234   : > { %v939_v11 = vadd.f32 1.0, %v1460_v44 }
 0x235   : > { %v1462_v15 = vpop.eup %1461 }
 0x236   : > { %v955_v46 = vmul.f32 %v939_v11, %v827_v23  ;;  %v1464_v17 = vpop.eup %1463  ;;  %v942_v9 = vadd.f32 1.0, %v1462_v15 }
 0x237   : > { %v940_v20 = vadd.f32 1.0, %v1464_v17 }
 0x238   : > { %v958_v21 = vmul.f32 %v942_v9, %v830_v19 }
 0x239   : > { %v956_v22 = vmul.f32 %v940_v20, %v828_v50 }
 0x23a LB: >> { %s1182_s9 = sshll.u32 %s1147_s0, 7  ;;  %s970_s15 = scalar_lea.vmem [#allocation2], %s1493_s8  ;;  %s1493_s8 = sphi %s1491_s8, %s964_s8  }
 0x23b   : >> { %s966_s10 = sadd.s32 %s1493_s8, %s1182_s9  ;;  %s964_s8 = sadd.s32 1, %s1493_s8  }
 0x23c   : >> { %s967_s11 = sld [smem:[#allocation4 + %s966_s10]]  ;;  %p961_p9 = scmp.ge.s32.totalorder %s964_s8, 128  }
 0x23e   : > { %963 = sbr.rel (!%p961_p9) target bundleno = 570 (0x23a), region = 83 }
 0x242   : >> { %s968_s14 = scalar_lea.vmem %s1883_s2, %s967_s11 }
 0x243   : >> { %v969_v57 = vld [vmem:[%s968_s14] sm:$0x1] }
 0x244   : >> { %971 = vst [vmem:[%s970_s15] sm:$0x1] %v969_v57 }
 0x24b   : > { %v972_v10 = vld [vmem:[#allocation2] sm:$0xff]  ;;  %v973_v25 = vld [vmem:[#allocation2 + $0x8] sm:$0xff]  ;;  %v974_v5 = vld [vmem:[#allocation2 + $0x10] sm:$0xff] }
 0x24c   : > { %v988_v26 = vmul.f32 %v972_v10, %v1789_v42  ;;  %v989_v58 = vmul.f32 %v973_v25, %v1801_v53  ;;  %v975_v63 = vld [vmem:[#allocation2 + $0x18] sm:$0xff]  ;;  %v990_v32 = vmul.f32 %v974_v5, %v1786_v39  ;;  %v976_v59 = vld [vmem:[#allocation2 + $0x20] sm:$0xff]  ;;  %v977_v28 = vld [vmem:[#allocation2 + $0x28] sm:$0xff] }
 0x24d   : > { %v991_v36 = vmul.f32 %v975_v63, %v1795_v35  ;;  %v992_v37 = vmul.f32 %v976_v59, %v1825_v16  ;;  %v993_v49 = vmul.f32 %v977_v28, %v1837_v33  ;;  %v978_v30 = vld [vmem:[#allocation2 + $0x30] sm:$0xff]  ;;  %v979_v38 = vld [vmem:[#allocation2 + $0x38] sm:$0xff]  ;;  %v980_v40 = vld [vmem:[#allocation2 + $0x40] sm:$0xff] }
 0x24e   : > { %v1220_v54 = vpack.c.bf16 %v989_v58, %v988_v26  ;;  %v994_v42 = vmul.f32 %v978_v30, %v1821_v24  ;;  %v995_v53 = vmul.f32 %v979_v38, %v1834_v29  ;;  %v981_v41 = vld [vmem:[#allocation2 + $0x48] sm:$0xff]  ;;  %v996_v45 = vmul.f32 %v980_v40, %v951_v0  ;;  %v982_v39 = vld [vmem:[#allocation2 + $0x50] sm:$0xff]  ;;  %v983_v43 = vld [vmem:[#allocation2 + $0x58] sm:$0xff] }
 0x24f   : > { %v1225_v35 = vpack.c.bf16 %v991_v36, %v990_v32  ;;  %v1230_v47 = vpack.c.bf16 %v993_v49, %v992_v37  ;;  %v997_v16 = vmul.f32 %v981_v41, %v952_v12  ;;  %v998_v33 = vmul.f32 %v982_v39, %v1844_v61  ;;  %v984_v34 = vld [vmem:[#allocation2 + $0x60] sm:$0xff]  ;;  %v985_v31 = vld [vmem:[#allocation2 + $0x68] sm:$0xff]  ;;  %v986_v52 = vld [vmem:[#allocation2 + $0x70] sm:$0xff] }
 0x250   : > { %1221 = vst [vmem:[%s1566_s20] sm:$0xff] %v1220_v54   ;;  %v1235_v24 = vpack.c.bf16 %v995_v53, %v994_v42  ;;  %v999_v29 = vmul.f32 %v983_v43, %v1848_v8  ;;  %v1000_v55 = vmul.f32 %v984_v34, %v955_v46  ;;  %v1001_v48 = vmul.f32 %v985_v31, %v956_v22  ;;  %v987_v56 = vld [vmem:[#allocation2 + $0x78] sm:$0xff] }
 0x251   : > { %1257 = vst [vmem:[%s1566_s20 + $0x8] sm:$0xff] %v1225_v35   ;;  %1258 = vst [vmem:[%s1566_s20 + $0x10] sm:$0xff] %v1230_v47   ;;  %v1240_v60 = vpack.c.bf16 %v997_v16, %v996_v45  ;;  %v1002_v62 = vmul.f32 %v986_v52, %v1851_v2  ;;  %v1003_v61 = vmul.f32 %v987_v56, %v958_v21 }
 0x252   : > { %1259 = vst [vmem:[%s1566_s20 + $0x18] sm:$0xff] %v1235_v24   ;;  %v1245_v0 = vpack.c.bf16 %v999_v29, %v998_v33  ;;  %v1250_v1 = vpack.c.bf16 %v1001_v48, %v1000_v55 }
 0x253   : > { %1260 = vst [vmem:[%s1566_s20 + $0x20] sm:$0xff] %v1240_v60   ;;  %v1255_v3 = vpack.c.bf16 %v1003_v61, %v1002_v62 }
 0x254   : > { %1261 = vst [vmem:[%s1566_s20 + $0x28] sm:$0xff] %v1245_v0   ;;  %1262 = vst [vmem:[%s1566_s20 + $0x30] sm:$0xff] %v1250_v1  }
 0x255   : > { %1263 = vst [vmem:[%s1566_s20 + $0x38] sm:$0xff] %v1255_v3  }
 0x256 PF: > { %s23_s29 = sadd.s32 1, %s1489_s29  }
 0x257   : > { %p20_p10 = scmp.ge.s32.totalorder %s23_s29, 4  }
 0x259   :  { %22 = sbr.rel (!%p20_p10) target bundleno = 16 (0x10), region = 94 }

</bundles_post_ra>
